<compile_context>
chip_gen: v7x
topology: tpu7x:2x2x1
jax: 0.10.0
libtpu: 0.0.40
codegen_flags: <defaults>
</compile_context>

<pallas_src>
import jax
import jax.numpy as jnp
from jax.experimental import pallas as pl
from jax.experimental.pallas import tpu as pltpu

_H1, _H2, _H3 = 1024, 256, 64
_MAX_K_TILE = 2048            # layer-1 K slab (multiple of 128)
_VMEM_HEADROOM = 8 << 20      # leave room for Mosaic internals
_MIN_VMEM_BUDGET = 16 << 20


def _round_up(x, m):
    return (x + m - 1) // m * m


def _cdiv(a, b):
    return (a + b - 1) // b


def _tpu_vmem_capacity():
    """Physical VMEM per TensorCore; conservative 64 MiB (v7x) fallback."""
    try:
        info = pltpu.get_tpu_info()
        cap = int(getattr(info, "vmem_capacity_bytes", 0) or 0)
        if cap > 0:
            return cap
    except Exception:
        pass
    return 64 << 20


def _k_tiling(input_dim, k_tile=None):
    """K-slab size (multiple of 128) and padded K extent."""
    k_full = _round_up(max(int(input_dim), 1), 128)
    tk = _MAX_K_TILE if k_tile is None else int(k_tile)
    tk = min(_round_up(tk, 128), k_full)
    kp = _round_up(int(input_dim), tk)
    return tk, kp


def _vmem_footprint(tb, tk):
    """Worst-case VMEM bytes for one grid step (double-buffered streams)."""
    return (2 * tb * tk * 4                       # f32 x tile, double-buffered
            + 2 * tk * _H1 * 2                    # bf16 w1 slab, double-buffered
            + tb * _H1 * 4                        # f32 layer-1 accumulator scratch
            + 2 * (_H1 * _H2 + _H2 * _H3) * 2     # resident w2/w3 (2 bufs each)
            + 2 * (_H1 + _H2 + 2 * _H3 + 1) * 4   # biases + w4 row
            + 2 * tb * 4)                         # f32 out tile, double-buffered


def _batch_tiling(batch, vmem_cap, tk, batch_tile=None):
    """Pick the batch tile; bigger tb => w1 streamed fewer times, but respect
    VMEM and keep >=2 batch tiles on 2-TensorCore (v7x-class) parts."""
    b_full = _round_up(max(int(batch), 1), 8)
    small_vmem = vmem_cap <= (64 << 20)           # v7x-class: 64 MiB/TC, 2 TCs
    if batch_tile is not None:
        tb = min(_round_up(int(batch_tile), 8), b_full)
    else:
        tb = min(1024 if small_vmem else 2048, b_full)
        tb = _round_up(tb, 8)
        # Megacore: ensure >= 2 batch tiles so both TensorCores get work.
        if small_vmem and tb == b_full and b_full >= 16:
            tb = _round_up(_cdiv(b_full, 2), 8)
    budget = max(vmem_cap - _VMEM_HEADROOM, _MIN_VMEM_BUDGET)
    while _vmem_footprint(tb, tk) > budget and tb > 256:
        tb = _round_up(max(tb // 2, 256), 8)
    bp = _round_up(b_full, tb)
    return tb, bp


def _mlp_kernel(x_ref,
                w1_ref, b1_ref,
                w2_ref, b2_ref,
                w3_ref, b3_ref,
                w4_ref, b4_ref,
                o_ref, acc_ref):
    """Fused 4-layer MLP.  Grid = (batch tile i, layer-1 K tile k)."""
    k = pl.program_id(1)

    @pl.when(k == 0)
    def _():
        acc_ref[...] = jnp.zeros_like(acc_ref)

    # Layer 1 partial product on the MXU.  The f32 x tile is converted to bf16
    # on the VPU here (hidden under the MXU) so the wrapper never materialises
    # an extra bf16 copy of x in HBM.
    acc_ref[...] += jnp.dot(x_ref[...].astype(jnp.bfloat16), w1_ref[...],
                            preferred_element_type=jnp.float32)

    @pl.when(k == pl.num_programs(1) - 1)
    def _():
        # Layer 1 epilogue: bias + ReLU.   Dropout(0.3) -> identity (eval).
        h = jnp.maximum(acc_ref[...] + b1_ref[...], 0.0)

        # Layer 2: Linear(1024, 256) + ReLU.  Dropout(0.2) -> identity (eval).
        h = jnp.dot(h.astype(jnp.bfloat16), w2_ref[...],
                    preferred_element_type=jnp.float32) + b2_ref[...]
        h = jnp.maximum(h, 0.0)

        # Layer 3: Linear(256, 64) + ReLU.
        h = jnp.dot(h.astype(jnp.bfloat16), w3_ref[...],
                    preferred_element_type=jnp.float32) + b3_ref[...]
        h = jnp.maximum(h, 0.0)

        # Layer 4: Linear(64, 1) as a VPU/XLU reduction (an N=1 MXU matmul
        # would waste a full systolic pass), then Sigmoid in f32.
        logit = jnp.sum(h * w4_ref[...], axis=-1, keepdims=True) + b4_ref[...]
        o_ref[...] = jax.nn.sigmoid(logit).astype(o_ref.dtype)


def prepare_params(params, *, k_tile=None):
    """One-time conversion of f32 (in,out)/(1,out) params to the kernel layout.

    Hoists the bf16 casts and the layer-1 K padding out of the per-call path so
    repeated inference never re-reads the f32 w1 from HBM.  Returns a dict of
    device arrays plus Python-int metadata ("input_dim", "k_tile")."""
    if "input_dim" in params:                    # already prepared
        return params
    input_dim = int(params["w1"].shape[0])
    tk, kp = _k_tiling(input_dim, k_tile)
    w1 = params["w1"].astype(jnp.bfloat16)
    if kp != input_dim:
        w1 = jnp.pad(w1, ((0, kp - input_dim), (0, 0)))
    return {
        "input_dim": input_dim,
        "k_tile": tk,
        "w1": w1,
        "w2": params["w2"].astype(jnp.bfloat16),
        "w3": params["w3"].astype(jnp.bfloat16),
        "w4": params["w4"].reshape(1, _H3).astype(jnp.float32),   # VPU reduce row
        "b1": params["b1"].reshape(1, _H1).astype(jnp.float32),
        "b2": params["b2"].reshape(1, _H2).astype(jnp.float32),
        "b3": params["b3"].reshape(1, _H3).astype(jnp.float32),
        "b4": params["b4"].reshape(1, 1).astype(jnp.float32),
    }


def sehi_degradation_predictor(x, params, *, batch_tile=None, k_tile=None):
    """x: any shape flattenable to (-1, input_dim).  Returns (B, 1) f32 in [0, 1].

    `params` may be either the raw dict from init_params or (preferably, for
    repeated inference) the output of prepare_params()."""
    p = prepare_params(params, k_tile=k_tile)
    input_dim, tk = p["input_dim"], p["k_tile"]
    kp = int(p["w1"].shape[0])                   # K already padded in the weights

    x2d = x.reshape(-1, input_dim).astype(jnp.float32)   # mirrors x.view(-1, D)
    batch = x2d.shape[0]

    vmem_cap = _tpu_vmem_capacity()
    tb, bp = _batch_tiling(batch, vmem_cap, tk, batch_tile)

    # Zero-pad x only when the tile grid requires it; no dtype cast here — the
    # kernel reads the native f32 tile and converts on the VPU.
    if bp != batch or kp != input_dim:
        x2d = jnp.pad(x2d, ((0, bp - batch), (0, kp - input_dim)))

    grid = (bp // tb, kp // tk)                  # K innermost
    const = lambda i, k: (0, 0)                  # resident weights / biases

    in_specs = [
        pl.BlockSpec((tb, tk), lambda i, k: (i, k)),     # x tile (streamed)
        pl.BlockSpec((tk, _H1), lambda i, k: (k, 0)),    # w1 K slab (streamed)
        pl.BlockSpec((1, _H1), const),                   # b1
        pl.BlockSpec((_H1, _H2), const),                 # w2 (VMEM-resident)
        pl.BlockSpec((1, _H2), const),                   # b2
        pl.BlockSpec((_H2, _H3), const),                 # w3 (VMEM-resident)
        pl.BlockSpec((1, _H3), const),                   # b3
        pl.BlockSpec((1, _H3), const),                   # w4 row
        pl.BlockSpec((1, 1), const),                     # b4
    ]
    out_specs = pl.BlockSpec((tb, 1), lambda i, k: (i, 0))

    n_batch_tiles = bp // tb
    flops = 2 * bp * (kp * _H1 + _H1 * _H2 + _H2 * _H3 + _H3)
    # Truthful HBM traffic: w1 is re-streamed once per batch tile (K is the
    # inner grid axis); x (f32) and the small weights are read once.
    bytes_accessed = (bp * kp * 4
                      + n_batch_tiles * kp * _H1 * 2
                      + (_H1 * _H2 + _H2 * _H3) * 2
                      + (_H1 + _H2 + 2 * _H3 + 1) * 4
                      + bp * 4)

    # VMEM limit from the actual footprint, capped at this generation's
    # physical capacity (v7x only has 64 MiB per TensorCore).
    vmem_bytes = _vmem_footprint(tb, tk)
    vmem_limit = int(min(max(int(vmem_bytes * 1.3), 32 << 20), vmem_cap))

    out = pl.pallas_call(
        _mlp_kernel,
        out_shape=jax.ShapeDtypeStruct((bp, 1), jnp.float32),
        grid_spec=pltpu.PrefetchScalarGridSpec(
            num_scalar_prefetch=0,
            grid=grid,
            in_specs=in_specs,
            out_specs=out_specs,
            scratch_shapes=[pltpu.VMEM((tb, _H1), jnp.float32)]),
        compiler_params=pltpu.CompilerParams(
            dimension_semantics=("parallel", "arbitrary"),
            vmem_limit_bytes=vmem_limit),
        cost_estimate=pl.CostEstimate(
            flops=int(flops),
            transcendentals=int(bp),
            bytes_accessed=int(bytes_accessed)),
    )(x2d, p["w1"], p["b1"], p["w2"], p["b2"],
      p["w3"], p["b3"], p["w4"], p["b4"])

    return out[:batch]


def init_params(key, input_dim):
    """Deterministic PyTorch-style (uniform +-1/sqrt(fan_in)) init.
    Weights stored as (in_features, out_features); biases as (1, out_features)."""
    dims = [(input_dim, _H1), (_H1, _H2), (_H2, _H3), (_H3, 1)]
    params = {}
    keys = jax.random.split(key, 2 * len(dims))
    for i, (fan_in, fan_out) in enumerate(dims):
        bound = 1.0 / jnp.sqrt(jnp.float32(fan_in))
        w = jax.random.uniform(keys[2 * i], (fan_in, fan_out),
                               minval=-bound, maxval=bound, dtype=jnp.float32)
        b = jax.random.uniform(keys[2 * i + 1], (1, fan_out),
                               minval=-bound, maxval=bound, dtype=jnp.float32)
        params[f"w{i + 1}"] = w
        params[f"b{i + 1}"] = b
    return params


def _reference(x, params):
    """Pure-JAX f32 reference of the eval-mode forward pass."""
    x2d = x.reshape(-1, params["w1"].shape[0]).astype(jnp.float32)
    h = jnp.maximum(x2d @ params["w1"] + params["b1"], 0.0)
    h = jnp.maximum(h @ params["w2"] + params["b2"], 0.0)
    h = jnp.maximum(h @ params["w3"] + params["b3"], 0.0)
    return jax.nn.sigmoid(h @ params["w4"] + params["b4"])


if __name__ == "__main__":
    # Small, module-consistent shapes: predictor built with input_dim = 16*16 = 256
    # (production default is 512*512); input x of shape (batch=2, 16, 16), which
    # the forward flattens to (2, 256).
    INPUT_DIM = 16 * 16
    key = jax.random.PRNGKey(0)
    k_x, k_p = jax.random.split(key)

    x = jax.random.normal(k_x, (2, 16, 16), dtype=jnp.float32)
    raw_params = init_params(k_p, INPUT_DIM)

    # Hoist the weight casts / padding out of the per-call path.
    params = prepare_params(raw_params)

    y = sehi_degradation_predictor(x, params)
    y = jax.block_until_ready(y)

    assert y.shape == (2, 1), y.shape
    assert bool(jnp.all((y >= 0.0) & (y <= 1.0))), "sigmoid output out of range"

    y_ref = _reference(x, raw_params)
    assert bool(jnp.allclose(y, y_ref, atol=2e-2, rtol=2e-2)), (
        "kernel deviates from f32 reference beyond bf16 tolerance")
    print("KERNEL_OK")
</pallas_src>

<mosaic_0001>
module attributes {stable_mosaic.version = 11 : i64} {
  func.func @_mlp_kernel(%arg0: i32, %arg1: i32, %arg2: memref<8x256xf32, #tpu.memory_space<vmem>>, %arg3: memref<256x1024xbf16, #tpu.memory_space<vmem>>, %arg4: memref<1x1024xf32, #tpu.memory_space<vmem>>, %arg5: memref<1024x256xbf16, #tpu.memory_space<vmem>>, %arg6: memref<1x256xf32, #tpu.memory_space<vmem>>, %arg7: memref<256x64xbf16, #tpu.memory_space<vmem>>, %arg8: memref<1x64xf32, #tpu.memory_space<vmem>>, %arg9: memref<1x64xf32, #tpu.memory_space<vmem>>, %arg10: memref<1x1xf32, #tpu.memory_space<vmem>>, %arg11: memref<8x1xf32, #tpu.memory_space<vmem>>, %arg12: memref<8x1024xf32, #tpu.memory_space<vmem>>) attributes {dimension_semantics = [#tpu.dimension_semantics<parallel>, #tpu.dimension_semantics<arbitrary>], iteration_bounds = array<i64: 1, 1>, scalar_prefetch = 0 : i64, scratch_operands = 1 : i64, tpu.core_type = #tpu.core_type<tc>, window_params = [{transform_indices = @transform_0, window_bounds = array<i64: 8, 256>}, {transform_indices = @transform_1, window_bounds = array<i64: 256, 1024>}, {pipeline_mode = #tpu.pipeline_mode<synchronous>, transform_indices = @transform_2, window_bounds = array<i64: 1, 1024>}, {pipeline_mode = #tpu.pipeline_mode<synchronous>, transform_indices = @transform_3, window_bounds = array<i64: 1024, 256>}, {pipeline_mode = #tpu.pipeline_mode<synchronous>, transform_indices = @transform_4, window_bounds = array<i64: 1, 256>}, {pipeline_mode = #tpu.pipeline_mode<synchronous>, transform_indices = @transform_5, window_bounds = array<i64: 256, 64>}, {pipeline_mode = #tpu.pipeline_mode<synchronous>, transform_indices = @transform_6, window_bounds = array<i64: 1, 64>}, {pipeline_mode = #tpu.pipeline_mode<synchronous>, transform_indices = @transform_7, window_bounds = array<i64: 1, 64>}, {pipeline_mode = #tpu.pipeline_mode<synchronous>, transform_indices = @transform_8, window_bounds = array<i64: 1, 1>}, {transform_indices = @transform_9, window_bounds = array<i64: 8, 1>}]} {
    %c0_i32 = arith.constant 0 : i32
    %0 = arith.cmpi eq, %arg1, %c0_i32 : i32
    %1 = arith.extui %0 : i1 to i32
    %c0_i32_0 = arith.constant 0 : i32
    %2 = arith.cmpi ne, %1, %c0_i32_0 : i32
    scf.if %2 {
      %cst_10 = arith.constant 0.000000e+00 : f32
      %13 = vector.broadcast %cst_10 : f32 to vector<8x1024xf32>
      %c0_11 = arith.constant 0 : index
      %c0_12 = arith.constant 0 : index
      %14 = vector.load %arg12[%c0_11, %c0_12] : memref<8x1024xf32, #tpu.memory_space<vmem>>, vector<8x1024xf32>
      tpu.vector_store %arg12[%c0_11, %c0_12], %13 {strides = array<i32>} : memref<8x1024xf32, #tpu.memory_space<vmem>>, vector<8x1024xf32>,
    } else {
    }
    %c0 = arith.constant 0 : index
    %c0_1 = arith.constant 0 : index
    %3 = vector.load %arg12[%c0, %c0_1] : memref<8x1024xf32, #tpu.memory_space<vmem>>, vector<8x1024xf32>
    %c0_2 = arith.constant 0 : index
    %c0_3 = arith.constant 0 : index
    %4 = vector.load %arg2[%c0_2, %c0_3] : memref<8x256xf32, #tpu.memory_space<vmem>>, vector<8x256xf32>
    %5 = arith.truncf %4 : vector<8x256xf32> to vector<8x256xbf16>
    %c0_4 = arith.constant 0 : index
    %c0_5 = arith.constant 0 : index
    %6 = vector.load %arg3[%c0_4, %c0_5] : memref<256x1024xbf16, #tpu.memory_space<vmem>>, vector<256x1024xbf16>
    %cst = arith.constant dense<0.000000e+00> : vector<8x1024xf32>
    %7 = tpu.matmul %5, %6, %cst {dimension_numbers = #tpu.dot_dimension_numbers<[1], [0], [0], [1], [0, 0, 1, 1], [], []>} : vector<8x256xbf16>, vector<256x1024xbf16>, vector<8x1024xf32> -> vector<8x1024xf32>
    %8 = arith.addf %3, %7 : vector<8x1024xf32>
    %c0_6 = arith.constant 0 : index
    %c0_7 = arith.constant 0 : index
    %9 = vector.load %arg12[%c0_6, %c0_7] : memref<8x1024xf32, #tpu.memory_space<vmem>>, vector<8x1024xf32>
    tpu.vector_store %arg12[%c0_6, %c0_7], %8 {strides = array<i32>} : memref<8x1024xf32, #tpu.memory_space<vmem>>, vector<8x1024xf32>,
    %c0_i32_8 = arith.constant 0 : i32
    %10 = arith.cmpi eq, %arg1, %c0_i32_8 : i32
    %11 = arith.extui %10 : i1 to i32
    %c0_i32_9 = arith.constant 0 : i32
    %12 = arith.cmpi ne, %11, %c0_i32_9 : i32
    scf.if %12 {
      %c0_10 = arith.constant 0 : index
      %c0_11 = arith.constant 0 : index
      %13 = vector.load %arg12[%c0_10, %c0_11] : memref<8x1024xf32, #tpu.memory_space<vmem>>, vector<8x1024xf32>
      %c0_12 = arith.constant 0 : index
      %c0_13 = arith.constant 0 : index
      %14 = vector.load %arg4[%c0_12, %c0_13] : memref<1x1024xf32, #tpu.memory_space<vmem>>, vector<1x1024xf32>
      %15 = vector.broadcast %14 : vector<1x1024xf32> to vector<8x1024xf32>
      %16 = arith.addf %13, %15 : vector<8x1024xf32>
      %cst_14 = arith.constant 0.000000e+00 : f32
      %17 = vector.broadcast %cst_14 : f32 to vector<8x1024xf32>
      %18 = arith.maximumf %16, %17 : vector<8x1024xf32>
      %19 = arith.truncf %18 : vector<8x1024xf32> to vector<8x1024xbf16>
      %c0_15 = arith.constant 0 : index
      %c0_16 = arith.constant 0 : index
      %20 = vector.load %arg5[%c0_15, %c0_16] : memref<1024x256xbf16, #tpu.memory_space<vmem>>, vector<1024x256xbf16>
      %cst_17 = arith.constant dense<0.000000e+00> : vector<8x256xf32>
      %21 = tpu.matmul %19, %20, %cst_17 {dimension_numbers = #tpu.dot_dimension_numbers<[1], [0], [0], [1], [0, 0, 1, 1], [], []>} : vector<8x1024xbf16>, vector<1024x256xbf16>, vector<8x256xf32> -> vector<8x256xf32>
      %c0_18 = arith.constant 0 : index
      %c0_19 = arith.constant 0 : index
      %22 = vector.load %arg6[%c0_18, %c0_19] : memref<1x256xf32, #tpu.memory_space<vmem>>, vector<1x256xf32>
      %23 = vector.broadcast %22 : vector<1x256xf32> to vector<8x256xf32>
      %24 = arith.addf %21, %23 : vector<8x256xf32>
      %cst_20 = arith.constant 0.000000e+00 : f32
      %25 = vector.broadcast %cst_20 : f32 to vector<8x256xf32>
      %26 = arith.maximumf %24, %25 : vector<8x256xf32>
      %27 = arith.truncf %26 : vector<8x256xf32> to vector<8x256xbf16>
      %c0_21 = arith.constant 0 : index
      %c0_22 = arith.constant 0 : index
      %28 = vector.load %arg7[%c0_21, %c0_22] : memref<256x64xbf16, #tpu.memory_space<vmem>>, vector<256x64xbf16>
      %cst_23 = arith.constant dense<0.000000e+00> : vector<8x64xf32>
      %29 = tpu.matmul %27, %28, %cst_23 {dimension_numbers = #tpu.dot_dimension_numbers<[1], [0], [0], [1], [0, 0, 1, 1], [], []>} : vector<8x256xbf16>, vector<256x64xbf16>, vector<8x64xf32> -> vector<8x64xf32>
      %c0_24 = arith.constant 0 : index
      %c0_25 = arith.constant 0 : index
      %30 = vector.load %arg8[%c0_24, %c0_25] : memref<1x64xf32, #tpu.memory_space<vmem>>, vector<1x64xf32>
      %31 = vector.broadcast %30 : vector<1x64xf32> to vector<8x64xf32>
      %32 = arith.addf %29, %31 : vector<8x64xf32>
      %cst_26 = arith.constant 0.000000e+00 : f32
      %33 = vector.broadcast %cst_26 : f32 to vector<8x64xf32>
      %34 = arith.maximumf %32, %33 : vector<8x64xf32>
      %c0_27 = arith.constant 0 : index
      %c0_28 = arith.constant 0 : index
      %35 = vector.load %arg9[%c0_27, %c0_28] : memref<1x64xf32, #tpu.memory_space<vmem>>, vector<1x64xf32>
      %36 = vector.broadcast %35 : vector<1x64xf32> to vector<8x64xf32>
      %37 = arith.mulf %34, %36 : vector<8x64xf32>
      %cst_29 = arith.constant dense<0.000000e+00> : vector<8xf32>
      %38 = vector.multi_reduction <add>, %37, %cst_29 [1] : vector<8x64xf32> to vector<8xf32>
      %39 = vector.shape_cast %38 : vector<8xf32> to vector<8x1xf32>
      %c0_30 = arith.constant 0 : index
      %c0_31 = arith.constant 0 : index
      %40 = vector.load %arg10[%c0_30, %c0_31] : memref<1x1xf32, #tpu.memory_space<vmem>>, vector<1x1xf32>
      %41 = vector.broadcast %40 : vector<1x1xf32> to vector<8x1xf32>
      %42 = arith.addf %39, %41 : vector<8x1xf32>
      %43 = arith.negf %42 : vector<8x1xf32>
      %44 = math.exp %43 : vector<8x1xf32>
      %cst_32 = arith.constant 1.000000e+00 : f32
      %45 = vector.broadcast %cst_32 : f32 to vector<8x1xf32>
      %46 = arith.addf %45, %44 : vector<8x1xf32>
      %47 = arith.divf %45, %46 : vector<8x1xf32>
      %c0_33 = arith.constant 0 : index
      %c0_34 = arith.constant 0 : index
      %48 = vector.load %arg11[%c0_33, %c0_34] : memref<8x1xf32, #tpu.memory_space<vmem>>, vector<8x1xf32>
      tpu.vector_store %arg11[%c0_33, %c0_34], %47 {strides = array<i32>} : memref<8x1xf32, #tpu.memory_space<vmem>>, vector<8x1xf32>,
    } else {
    }
    return
  }
  func.func @transform_0(%arg0: i32, %arg1: i32) -> (i32, i32) {
    %c0_i32 = arith.constant 0 : i32
    return %arg0, %arg1 : i32, i32
  }
  func.func @transform_1(%arg0: i32, %arg1: i32) -> (i32, i32) {
    %c0_i32 = arith.constant 0 : i32
    %c0_i32_0 = arith.constant 0 : i32
    return %arg1, %c0_i32 : i32, i32
  }
  func.func @transform_2(%arg0: i32, %arg1: i32) -> (i32, i32) {
    %c0_i32 = arith.constant 0 : i32
    %c0_i32_0 = arith.constant 0 : i32
    %c0_i32_1 = arith.constant 0 : i32
    return %c0_i32, %c0_i32_0 : i32, i32
  }
  func.func @transform_3(%arg0: i32, %arg1: i32) -> (i32, i32) {
    %c0_i32 = arith.constant 0 : i32
    %c0_i32_0 = arith.constant 0 : i32
    %c0_i32_1 = arith.constant 0 : i32
    return %c0_i32, %c0_i32_0 : i32, i32
  }
  func.func @transform_4(%arg0: i32, %arg1: i32) -> (i32, i32) {
    %c0_i32 = arith.constant 0 : i32
    %c0_i32_0 = arith.constant 0 : i32
    %c0_i32_1 = arith.constant 0 : i32
    return %c0_i32, %c0_i32_0 : i32, i32
  }
  func.func @transform_5(%arg0: i32, %arg1: i32) -> (i32, i32) {
    %c0_i32 = arith.constant 0 : i32
    %c0_i32_0 = arith.constant 0 : i32
    %c0_i32_1 = arith.constant 0 : i32
    return %c0_i32, %c0_i32_0 : i32, i32
  }
  func.func @transform_6(%arg0: i32, %arg1: i32) -> (i32, i32) {
    %c0_i32 = arith.constant 0 : i32
    %c0_i32_0 = arith.constant 0 : i32
    %c0_i32_1 = arith.constant 0 : i32
    return %c0_i32, %c0_i32_0 : i32, i32
  }
  func.func @transform_7(%arg0: i32, %arg1: i32) -> (i32, i32) {
    %c0_i32 = arith.constant 0 : i32
    %c0_i32_0 = arith.constant 0 : i32
    %c0_i32_1 = arith.constant 0 : i32
    return %c0_i32, %c0_i32_0 : i32, i32
  }
  func.func @transform_8(%arg0: i32, %arg1: i32) -> (i32, i32) {
    %c0_i32 = arith.constant 0 : i32
    %c0_i32_0 = arith.constant 0 : i32
    %c0_i32_1 = arith.constant 0 : i32
    return %c0_i32, %c0_i32_0 : i32, i32
  }
  func.func @transform_9(%arg0: i32, %arg1: i32) -> (i32, i32) {
    %c0_i32 = arith.constant 0 : i32
    %c0_i32_0 = arith.constant 0 : i32
    return %arg0, %c0_i32 : i32, i32
  }
}

</mosaic_0001>

<bundles_post_ra>
// kernel: tpu_custom_call.1
= control target key start
LH: loop header
LB: loop body
LE: loop exit
PB: predicated region body
PF: predicated region fallthrough
CT: control target
= control target key end

     0   :  { %s3040_s0 = inlined_call_operand.vmem [shape: f32[8,256], index: 0, kind: input, shape index: {}]   ;;  %s3041_s1 = inlined_call_operand.hbm [shape: bf16[256,1024], index: 1, kind: input, shape index: {}]   ;;  %s3042_s2 = inlined_call_operand.vmem [shape: f32[1,1024], index: 2, kind: input, shape index: {}]   ;;  %s3043_s3 = inlined_call_operand.hbm [shape: bf16[1024,256], index: 3, kind: input, shape index: {}]   ;;  %s3044_s4 = inlined_call_operand.vmem [shape: f32[1,256], index: 4, kind: input, shape index: {}]   ;;  %s3045_s5 = inlined_call_operand.vmem [shape: bf16[256,64], index: 5, kind: input, shape index: {}]   ;;  %s3046_s6 = inlined_call_operand.vmem [shape: f32[1,64], index: 6, kind: input, shape index: {}]   ;;  %s3047_s7 = inlined_call_operand.vmem [shape: f32[1,64], index: 7, kind: input, shape index: {}]   ;;  %s3048_s8 = inlined_call_operand.<no memory space> [shape: f32[1,1], index: 8, kind: input, shape index: {}]   ;;  %s3049_s9 = inlined_call_operand.vmem [shape: f32[8,1], index: 9, kind: output, shape index: {}]  }
   0x1   :  { %v14_v0 = vstv %s3048_s8 }
   0x2   :  { %15 = vst [vmem:[#allocation3] sm:$0x1] %v14_v0 }
   0x3   :  { %16 = vsyncpa [#allocation5], 0 }
   0x4   :  { %17 = vsyncpa [#allocation7], 0  ;;  %s2848_s11 = smov [#allocation4]   ;;  %s2800_s15 = scalar_lea.hbm %s3041_s1, 16384 }
   0x5   :  { %s25_s12 = sshll.u32 %s2848_s11, 4  ;;  %p2801_p0 = scmp.ne.s32.totalorder %s3041_s1, %s2800_s15  ;;  %s26_s12 = int_to_ptr.vmem [resolvable:$true] %s25_s12 }
   0x6   :  { %p2804_p1 = scmp.lt.u32.totalorder %s2800_s15, %s3041_s1 }
   0x8   :  { %p2806_p2 = pnand %p2804_p1, %p2801_p0 }
   0xa   :  { %2809 = shalt.err (!%p2806_p2)
}
   0xb   :  { %s2810_s8 = scalar_lea.vmem %s26_s12, 16384  ;;  %p2815_p4 = scmp.lt.s32.totalorder %s26_s12, %s26_s12 }
   0xc   :  { %p2811_p3 = scmp.ne.s32.totalorder %s26_s12, %s2810_s8  ;;  %p2816_p5 = scmp.lt.s32.totalorder %s2810_s8, %s2810_s8 }
   0xe   :  { %p2817_p6 = por %p2816_p5, %p2815_p4 }
  0x10   :  { %p2818_p7 = pnand %p2817_p6, %p2811_p3 }
  0x12   :  { %2821 = shalt.err (!%p2818_p7)
}
  0x13   :  { %s2849_s20 = smov 512   ;;  %s2850_s21 = smov 32  }
  0x14   :  { %31 = dma.hbm_to_vmem [thread:$0]  %s3041_s1, 16384, %s26_s12, [#allocation5], %s2849_s20, %s2849_s20, %s2850_s21  }
  0x15   :  { %s2851_s24 = smov [#allocation6]   ;;  %s2822_s28 = scalar_lea.hbm %s3043_s3, 16384 }
  0x16   :  { %s39_s25 = sshll.u32 %s2851_s24, 4  ;;  %p2823_p8 = scmp.ne.s32.totalorder %s3043_s3, %s2822_s28  ;;  %s40_s25 = int_to_ptr.vmem [resolvable:$true] %s39_s25 }
  0x17   :  { %p2826_p9 = scmp.lt.u32.totalorder %s2822_s28, %s3043_s3 }
  0x19   :  { %p2828_p10 = pnand %p2826_p9, %p2823_p8 }
  0x1b   :  { %2831 = shalt.err (!%p2828_p10)
}
  0x1c   :  { %s2832_s13 = scalar_lea.vmem %s40_s25, 16384  ;;  %p2837_p12 = scmp.lt.s32.totalorder %s40_s25, %s40_s25 }
  0x1d   :  { %p2833_p11 = scmp.ne.s32.totalorder %s40_s25, %s2832_s13  ;;  %p2838_p13 = scmp.lt.s32.totalorder %s2832_s13, %s2832_s13 }
  0x1f   :  { %p2839_p0 = por %p2838_p13, %p2837_p12 }
  0x21   :  { %p2840_p1 = pnand %p2839_p0, %p2833_p11 }
  0x23   :  { %2843 = shalt.err (!%p2840_p1)
}
  0x24   :  { %s2852_s1 = smov 128   ;;  %s2853_s12 = smov 8  }
  0x25   :  { %45 = dma.hbm_to_vmem [thread:$0]  %s3043_s3, 16384, %s40_s25, [#allocation7], %s2852_s1, %s2852_s1, %s2853_s12  }
  0x26   :  { %2844 = dma.done.wait [#allocation5], 16384  }
  0x27   :  { %2845 = vsyncadd [#allocation5], 4294950912 }
  0x28   :  { %2846 = dma.done.wait [#allocation7], 16384  }
  0x29   :  { %2847 = vsyncadd [#allocation7], 4294950912  ;;  %v87_v1 = vld [vmem:[#allocation4] sm:$0xff]  ;;  %vm2244_vm0 = vcmask 523264   ;;  %vm2262_vm1 = vcmask 7168  }
  0x2a   :  { %v91_v2 = vld [vmem:[#allocation4 + $0x20] sm:$0xff] }
  0x2b   :  { %v95_v3 = vld [vmem:[#allocation4 + $0x40] sm:$0xff]  ;;  %v2271_v4 = vcombine.high %v87_v1, %v91_v2  ;;  %v2270_v5 = vcombine.low %v87_v1, %v91_v2  ;;  %v88_v1 = vld [vmem:[#allocation4 + $0x8] sm:$0xff] }
  0x2c   :  { %v99_v6 = vld [vmem:[#allocation4 + $0x60] sm:$0xff]  ;;  %v92_v2 = vld [vmem:[#allocation4 + $0x28] sm:$0xff] }
  0x2d   :  { %v2279_v7 = vcombine.high %v95_v3, %v99_v6  ;;  %v103_v8 = vld [vmem:[#allocation4 + $0x80] sm:$0xff]  ;;  %855 = vmatprep.subr.bf16.mxu1 %v2271_v4  ;;  %v2278_v10 = vcombine.low %v95_v3, %v99_v6  ;;  %v96_v6 = vld [vmem:[#allocation4 + $0x48] sm:$0xff] }
  0x2e   :  { %v107_v9 = vld [vmem:[#allocation4 + $0xa0] sm:$0xff]  ;;  %856 = vmatpush1.bf16.msra.mxu1 %v2270_v5 }
  0x2f   :  { %857 = vmatprep.subr.bf16.mxu1 %v2279_v7  ;;  %v2287_v11 = vcombine.high %v103_v8, %v107_v9  ;;  %v111_v12 = vld [vmem:[#allocation4 + $0xc0] sm:$0xff]  ;;  %v2286_v14 = vcombine.low %v103_v8, %v107_v9  ;;  %v100_v7 = vld [vmem:[#allocation4 + $0x68] sm:$0xff]  ;;  %v2273_v8 = vcombine.high %v88_v1, %v92_v2 }
  0x30   :  { %v115_v13 = vld [vmem:[#allocation4 + $0xe0] sm:$0xff] }
  0x31   :  { %v2295_v15 = vcombine.high %v111_v12, %v115_v13  ;;  %v119_v16 = vld [vmem:[#allocation4 + $0x100] sm:$0xff]  ;;  %v2294_v20 = vcombine.low %v111_v12, %v115_v13  ;;  %v108_v12 = vld [vmem:[#allocation4 + $0xa8] sm:$0xff]  ;;  %v2281_v13 = vcombine.high %v96_v6, %v100_v7 }
  0x32   :  { %858 = vmatpush1.bf16.msra.mxu1 %v2278_v10  ;;  %v123_v17 = vld [vmem:[#allocation4 + $0x120] sm:$0xff]  ;;  %v2272_v10 = vcombine.low %v88_v1, %v92_v2  ;;  %v192_v2 = vld [vmem:[#allocation4 + $0x348] sm:$0xff] }
  0x33   :  { %859 = vmatprep.subr.bf16.mxu1 %v2287_v11  ;;  %v84_v18 = vld [vmem:[%s3040_s0 + $0x8] sm:$0xff]  ;;  %v2303_v21 = vcombine.high %v119_v16, %v123_v17  ;;  %v2302_v24 = vcombine.low %v119_v16, %v123_v17  ;;  %v83_v4 = vld [vmem:[%s3040_s0] sm:$0xff] }
  0x34   :  { %v2934_v19 = vpack.c.bf16 %v84_v18, %v84_v18  ;;  %v127_v22 = vld [vmem:[#allocation4 + $0x140] sm:$0xff]  ;;  %v2940_v9 = vpack.c.bf16 %v83_v4, %v83_v4  ;;  %v104_v11 = vld [vmem:[#allocation4 + $0x88] sm:$0xff] }
  0x35   :  { %v131_v23 = vld [vmem:[#allocation4 + $0x160] sm:$0xff]  ;;  %v116_v16 = vld [vmem:[#allocation4 + $0xe8] sm:$0xff]  ;;  %v2289_v17 = vcombine.high %v104_v11, %v108_v12  ;;  %v2288_v18 = vcombine.low %v104_v11, %v108_v12  ;;  %v2605_v11 = vld [vmem:[#allocation6 + $0x50] ss:$8 sps:$4 sm:$0xff]  }
  0x36   :  { %860 = vmatpush1.bf16.msra.mxu1 %v2286_v14  ;;  %887 = vmatprep.mubr.bf16.mxu1 %v2934_v19  ;;  %v2311_v25 = vcombine.high %v127_v22, %v131_v23  ;;  %v135_v26 = vld [vmem:[#allocation4 + $0x180] sm:$0xff]  ;;  %v2310_v28 = vcombine.low %v127_v22, %v131_v23  ;;  %v2280_v14 = vcombine.low %v96_v6, %v100_v7  ;;  %v2603_v7 = vld [vmem:[#allocation6 + $0x54] ss:$8 sps:$4 sm:$0xff]  }
  0x37   :  { %861 = vmatprep.subr.bf16.mxu1 %v2295_v15  ;;  %v139_v27 = vld [vmem:[#allocation4 + $0x1a0] sm:$0xff]  ;;  %v112_v15 = vld [vmem:[#allocation4 + $0xc8] sm:$0xff] }
  0x38   :  { %v2319_v29 = vcombine.high %v135_v26, %v139_v27  ;;  %v143_v30 = vld [vmem:[#allocation4 + $0x1c0] sm:$0xff]  ;;  %v2318_v32 = vcombine.low %v135_v26, %v139_v27  ;;  %v2297_v22 = vcombine.high %v112_v15, %v116_v16  ;;  %v2296_v23 = vcombine.low %v112_v15, %v116_v16  ;;  %v208_v15 = vld [vmem:[#allocation4 + $0x3c8] sm:$0xff] }
  0x39   :  { %v147_v31 = vld [vmem:[#allocation4 + $0x1e0] sm:$0xff]  ;;  %v212_v16 = vld [vmem:[#allocation4 + $0x3e8] sm:$0xff] }
  0x3a   :  { %862 = vmatpush1.bf16.msra.mxu1 %v2294_v20  ;;  %v2327_v33 = vcombine.high %v143_v30, %v147_v31  ;;  %v151_v34 = vld [vmem:[#allocation4 + $0x200] sm:$0xff]  ;;  %v2326_v36 = vcombine.low %v143_v30, %v147_v31  ;;  %v120_v20 = vld [vmem:[#allocation4 + $0x108] sm:$0xff] }
  0x3b   :  { %863 = vmatprep.subr.bf16.mxu1 %v2303_v21  ;;  %v155_v35 = vld [vmem:[#allocation4 + $0x220] sm:$0xff]  ;;  %v124_v21 = vld [vmem:[#allocation4 + $0x128] sm:$0xff] }
  0x3c   :  { %v159_v37 = vld [vmem:[#allocation4 + $0x240] sm:$0xff]  ;;  %v2335_v39 = vcombine.high %v151_v34, %v155_v35  ;;  %v2334_v40 = vcombine.low %v151_v34, %v155_v35  ;;  %v2305_v26 = vcombine.high %v120_v20, %v124_v21  ;;  %v2304_v27 = vcombine.low %v120_v20, %v124_v21  ;;  %v2609_v21 = vld [vmem:[#allocation6 + $0x74] ss:$8 sps:$4 sm:$0xff]  }
  0x3d   :  { %v163_v38 = vld [vmem:[#allocation4 + $0x260] sm:$0xff]  ;;  %v2393_v20 = vcombine.high %v208_v15, %v212_v16 }
  0x3e   :  { %864 = vmatpush1.bf16.msra.mxu1 %v2302_v24  ;;  %v167_v41 = vld [vmem:[#allocation4 + $0x280] sm:$0xff]  ;;  %v2343_v43 = vcombine.high %v159_v37, %v163_v38  ;;  %v2342_v44 = vcombine.low %v159_v37, %v163_v38  ;;  %v128_v24 = vld [vmem:[#allocation4 + $0x148] sm:$0xff] }
  0x3f   :  { %865 = vmatprep.subr.bf16.mxu1 %v2311_v25  ;;  %v171_v42 = vld [vmem:[#allocation4 + $0x2a0] sm:$0xff]  ;;  %v132_v25 = vld [vmem:[#allocation4 + $0x168] sm:$0xff] }
  0x40   :  { %v175_v45 = vld [vmem:[#allocation4 + $0x2c0] sm:$0xff]  ;;  %v2351_v47 = vcombine.high %v167_v41, %v171_v42  ;;  %v2350_v48 = vcombine.low %v167_v41, %v171_v42  ;;  %v2313_v30 = vcombine.high %v128_v24, %v132_v25  ;;  %v2312_v31 = vcombine.low %v128_v24, %v132_v25  ;;  %v156_v38 = vld [vmem:[#allocation4 + $0x228] sm:$0xff]  ;;  %v2611_v24 = vld [vmem:[#allocation6 + $0x70] ss:$8 sps:$4 sm:$0xff]  }
  0x41   :  { %v179_v46 = vld [vmem:[#allocation4 + $0x2e0] sm:$0xff]  ;;  %v160_v42 = vld [vmem:[#allocation4 + $0x248] sm:$0xff]  ;;  %v2392_v25 = vcombine.low %v208_v15, %v212_v16 }
  0x42   :  { %866 = vmatpush1.bf16.msra.mxu1 %v2310_v28  ;;  %v183_v49 = vld [vmem:[#allocation4 + $0x300] sm:$0xff]  ;;  %v2359_v51 = vcombine.high %v175_v45, %v179_v46  ;;  %v2358_v52 = vcombine.low %v175_v45, %v179_v46  ;;  %v136_v28 = vld [vmem:[#allocation4 + $0x188] sm:$0xff] }
  0x43   :  { %867 = vmatprep.subr.bf16.mxu1 %v2319_v29  ;;  %v187_v50 = vld [vmem:[#allocation4 + $0x320] sm:$0xff]  ;;  %v140_v29 = vld [vmem:[#allocation4 + $0x1a8] sm:$0xff] }
  0x44   :  { %v191_v53 = vld [vmem:[#allocation4 + $0x340] sm:$0xff]  ;;  %v2367_v55 = vcombine.high %v183_v49, %v187_v50  ;;  %v2366_v56 = vcombine.low %v183_v49, %v187_v50  ;;  %v2321_v34 = vcombine.high %v136_v28, %v140_v29  ;;  %v2320_v35 = vcombine.low %v136_v28, %v140_v29  ;;  %v172_v49 = vld [vmem:[#allocation4 + $0x2a8] sm:$0xff]  ;;  %v2593_v50 = vld [vmem:[#allocation6 + $0x10] ss:$8 sps:$4 sm:$0xff]  }
  0x45   :  { %v195_v54 = vld [vmem:[#allocation4 + $0x360] sm:$0xff]  ;;  %v97_v28 = vld [vmem:[#allocation4 + $0x50] sm:$0xff] }
  0x46   :  { %868 = vmatpush1.bf16.msra.mxu1 %v2318_v32  ;;  %v199_v57 = vld [vmem:[#allocation4 + $0x380] sm:$0xff]  ;;  %v2375_v59 = vcombine.high %v191_v53, %v195_v54  ;;  %v2374_v60 = vcombine.low %v191_v53, %v195_v54  ;;  %v144_v32 = vld [vmem:[#allocation4 + $0x1c8] sm:$0xff]  ;;  %v101_v29 = vld [vmem:[#allocation4 + $0x70] sm:$0xff] }
  0x47   :  { %869 = vmatprep.subr.bf16.mxu1 %v2327_v33  ;;  %v203_v58 = vld [vmem:[#allocation4 + $0x3a0] sm:$0xff]  ;;  %v148_v33 = vld [vmem:[#allocation4 + $0x1e8] sm:$0xff] }
  0x48   :  { %v207_v61 = vld [vmem:[#allocation4 + $0x3c0] sm:$0xff]  ;;  %v2383_v63 = vcombine.high %v199_v57, %v203_v58  ;;  %v2382_v0 = vcombine.low %v199_v57, %v203_v58  ;;  %v2329_v37 = vcombine.high %v144_v32, %v148_v33  ;;  %v176_v54 = vld [vmem:[#allocation4 + $0x2c8] sm:$0xff] }
  0x49   :  { %v211_v62 = vld [vmem:[#allocation4 + $0x3e0] sm:$0xff] }
  0x4a   :  { %870 = vmatpush1.bf16.msra.mxu1 %v2326_v36  ;;  %v2391_v3 = vcombine.high %v207_v61, %v211_v62  ;;  %v2390_v5 = vcombine.low %v207_v61, %v211_v62  ;;  %v152_v36 = vld [vmem:[#allocation4 + $0x208] sm:$0xff]  ;;  %v2599_v62 = vld [vmem:[#allocation6 + $0x30] ss:$8 sps:$4 sm:$0xff]  }
  0x4b   :  { %871 = vmatprep.subr.bf16.mxu1 %v2335_v39  ;;  %v2328_v39 = vcombine.low %v144_v32, %v148_v33  ;;  %v2588_v41 = vld [vmem:[#allocation6 + $0x4] ss:$8 sps:$4 sm:$0xff]   ;;  %v2336_v45 = vcombine.low %v152_v36, %v156_v38  ;;  %v2602_v4 = vld [vmem:[#allocation6 + $0x40] ss:$8 sps:$4 sm:$0xff]   ;;  %v2283_v32 = vcombine.high %v97_v28, %v101_v29  ;;  %v2615_v33 = vld [vmem:[#allocation6 + $0x94] ss:$8 sps:$4 sm:$0xff]  }
  0x4c   :  { %1892 = vmatprep.subr.bf16.mxu0 %v2588_v41  ;;  %v2594_v53 = vld [vmem:[#allocation6 + $0x24] ss:$8 sps:$4 sm:$0xff]   ;;  %v113_v41 = vld [vmem:[#allocation4 + $0xd0] sm:$0xff] }
  0x4d   :  { %v188_v61 = vld [vmem:[#allocation4 + $0x328] sm:$0xff] }
  0x4e   :  { %872 = vmatpush1.bf16.msra.mxu1 %v2334_v40  ;;  %v2337_v40 = vcombine.high %v152_v36, %v156_v38  ;;  %v2600_v1 = vld [vmem:[#allocation6 + $0x44] ss:$8 sps:$4 sm:$0xff]   ;;  %v2617_v36 = vld [vmem:[#allocation6 + $0x90] ss:$8 sps:$4 sm:$0xff]   ;;  %v2282_v38 = vcombine.low %v97_v28, %v101_v29 }
  0x4f   :  { %873 = vmatprep.subr.bf16.mxu1 %v2343_v43  ;;  %v164_v43 = vld [vmem:[#allocation4 + $0x268] sm:$0xff] }
  0x50   :  { %v2345_v46 = vcombine.high %v160_v42, %v164_v43 }
  0x52   :  { %874 = vmatpush1.bf16.msra.mxu1 %v2342_v44  ;;  %v2590_v44 = vld [vmem:[#allocation6] ss:$8 sps:$4 sm:$0xff]  }
  0x53   :  { %875 = vmatprep.subr.bf16.mxu1 %v2351_v47  ;;  %1893 = vmatpush1.bf16.msra.mxu0 %v2590_v44  ;;  %v2591_v47 = vld [vmem:[#allocation6 + $0x14] ss:$8 sps:$4 sm:$0xff]  }
  0x54   :  { %1894 = vmatprep.subr.bf16.mxu0 %v2591_v47  ;;  %v121_v47 = vld [vmem:[#allocation4 + $0x110] sm:$0xff] }
  0x56   :  { %876 = vmatpush1.bf16.msra.mxu1 %v2350_v48  ;;  %v168_v48 = vld [vmem:[#allocation4 + $0x288] sm:$0xff] }
  0x57   :  { %877 = vmatprep.subr.bf16.mxu1 %v2359_v51  ;;  %v2344_v51 = vcombine.low %v160_v42, %v164_v43  ;;  %1895 = vmatpush1.bf16.msra.mxu0 %v2593_v50  ;;  %v2352_v57 = vcombine.low %v168_v48, %v172_v49  ;;  %v117_v42 = vld [vmem:[#allocation4 + $0xf0] sm:$0xff] }
  0x58   :  { %1896 = vmatprep.subr.bf16.mxu0 %v2594_v53  ;;  %v2621_v43 = vld [vmem:[#allocation6 + $0xb4] ss:$8 sps:$4 sm:$0xff]   ;;  %v2298_v50 = vcombine.low %v113_v41, %v117_v42 }
  0x59   :  { %v129_v53 = vld [vmem:[#allocation4 + $0x150] sm:$0xff] }
  0x5a   :  { %878 = vmatpush1.bf16.msra.mxu1 %v2358_v52  ;;  %v2353_v52 = vcombine.high %v168_v48, %v172_v49  ;;  %v125_v48 = vld [vmem:[#allocation4 + $0x130] sm:$0xff]  ;;  %v2624_v49 = vld [vmem:[#allocation6 + $0xc4] ss:$8 sps:$4 sm:$0xff]  }
  0x5b   :  { %879 = vmatprep.subr.bf16.mxu1 %v2367_v55  ;;  %v180_v55 = vld [vmem:[#allocation4 + $0x2e8] sm:$0xff] }
  0x5c   :  { %v2361_v58 = vcombine.high %v176_v54, %v180_v55 }
  0x5e   :  { %880 = vmatpush1.bf16.msra.mxu1 %v2366_v56  ;;  %v2596_v56 = vld [vmem:[#allocation6 + $0x20] ss:$8 sps:$4 sm:$0xff]  }
  0x5f   :  { %881 = vmatprep.subr.bf16.mxu1 %v2375_v59  ;;  %1897 = vmatpush1.bf16.msra.mxu0 %v2596_v56  ;;  %v2597_v59 = vld [vmem:[#allocation6 + $0x34] ss:$8 sps:$4 sm:$0xff]   ;;  %v2306_v56 = vcombine.low %v121_v47, %v125_v48 }
  0x60   :  { %1898 = vmatprep.subr.bf16.mxu0 %v2597_v59  ;;  %v137_v59 = vld [vmem:[#allocation4 + $0x190] sm:$0xff] }
  0x62   :  { %882 = vmatpush1.bf16.msra.mxu1 %v2374_v60  ;;  %v184_v60 = vld [vmem:[#allocation4 + $0x308] sm:$0xff] }
  0x63   :  { %883 = vmatprep.subr.bf16.mxu1 %v2383_v63  ;;  %v2360_v63 = vcombine.low %v176_v54, %v180_v55  ;;  %1899 = vmatpush1.bf16.msra.mxu0 %v2599_v62  ;;  %v133_v54 = vld [vmem:[#allocation4 + $0x170] sm:$0xff] }
  0x64   :  { %1900 = vmatprep.subr.bf16.mxu0 %v2600_v1  ;;  %v2627_v55 = vld [vmem:[#allocation6 + $0xd4] ss:$8 sps:$4 sm:$0xff]  }
  0x65   :  { %v149_v1 = vld [vmem:[#allocation4 + $0x1f0] sm:$0xff] }
  0x66   :  { %884 = vmatpush1.bf16.msra.mxu1 %v2382_v0  ;;  %v2369_v0 = vcombine.high %v184_v60, %v188_v61 }
  0x67   :  { %885 = vmatprep.subr.bf16.mxu1 %v2391_v3  ;;  %v196_v3 = vld [vmem:[#allocation4 + $0x368] sm:$0xff]  ;;  %1901 = vmatpush1.bf16.msra.mxu0 %v2602_v4 }
  0x68   :  { %v2377_v6 = vcombine.high %v192_v2, %v196_v3  ;;  %1902 = vmatprep.subr.bf16.mxu0 %v2603_v7  ;;  %v2376_v12 = vcombine.low %v192_v2, %v196_v3  ;;  %v2632_v2 = vld [vmem:[#allocation6 + $0xe0] ss:$8 sps:$4 sm:$0xff]   ;;  %v157_v7 = vld [vmem:[#allocation4 + $0x230] sm:$0xff] }
  0x6a   :  { %886 = vmatpush1.bf16.msra.mxu1 %v2390_v5  ;;  %v2368_v5 = vcombine.low %v184_v60, %v188_v61  ;;  %v141_v60 = vld [vmem:[#allocation4 + $0x1b0] sm:$0xff]  ;;  %v2314_v61 = vcombine.low %v129_v53, %v133_v54 }
  0x6b   :  { %896 = vmatprep.subr.bf16.mxu1 %v2273_v8  ;;  %v200_v8 = vld [vmem:[#allocation4 + $0x388] sm:$0xff]  ;;  %1903 = vmatpush1.bf16.msra.mxu0 %v2605_v11  ;;  %v2323_v62 = vcombine.high %v137_v59, %v141_v60  ;;  %v2322_v3 = vcombine.low %v137_v59, %v141_v60  ;;  %v126_v59 = vld [vmem:[#allocation4 + $0x138] sm:$0xff] }
  0x6d   :  { %888 = vmatmul.mubr.bf16.vlgmr.msra.gmra.mrb[0].mxu1 %v2940_v9 }
  0x6e   :  { %897 = vmatpush1.bf16.msra.mxu1 %v2272_v10  ;;  %928 = vmatprep.mubr.bf16.mxu1 %v2934_v19  ;;  %v204_v10 = vld [vmem:[#allocation4 + $0x3a8] sm:$0xff] }
  0x6f   :  { %898 = vmatprep.subr.bf16.mxu1 %v2281_v13  ;;  %v2385_v13 = vcombine.high %v200_v8, %v204_v10 }
  0x72   :  { %899 = vmatpush1.bf16.msra.mxu1 %v2280_v14  ;;  %v2606_v14 = vld [vmem:[#allocation6 + $0x64] ss:$8 sps:$4 sm:$0xff]  }
  0x73   :  { %900 = vmatprep.subr.bf16.mxu1 %v2289_v17  ;;  %v2608_v17 = vld [vmem:[#allocation6 + $0x60] ss:$8 sps:$4 sm:$0xff]   ;;  %1904 = vmatprep.subr.bf16.mxu0 %v2606_v14  ;;  %v165_v14 = vld [vmem:[#allocation4 + $0x270] sm:$0xff] }
  0x74   :  { %1905 = vmatpush1.bf16.msra.mxu0 %v2608_v17  ;;  %v169_v17 = vld [vmem:[#allocation4 + $0x290] sm:$0xff] }
  0x75   :  { %1906 = vmatprep.subr.bf16.mxu0 %v2609_v21 }
  0x76   :  { %901 = vmatpush1.bf16.msra.mxu1 %v2288_v18  ;;  %v2384_v18 = vcombine.low %v200_v8, %v204_v10  ;;  %v2635_v8 = vld [vmem:[#allocation6 + $0xf0] ss:$8 sps:$4 sm:$0xff]  }
  0x77   :  { %902 = vmatprep.subr.bf16.mxu1 %v2297_v22  ;;  %v89_v22 = vld [vmem:[#allocation4 + $0x10] sm:$0xff] }
  0x78   :  { %1907 = vmatpush1.bf16.msra.mxu0 %v2611_v24 }
  0x7a   :  { %903 = vmatpush1.bf16.msra.mxu1 %v2296_v23  ;;  %v93_v23 = vld [vmem:[#allocation4 + $0x30] sm:$0xff] }
  0x7b   :  { %904 = vmatprep.subr.bf16.mxu1 %v2305_v26  ;;  %v2275_v26 = vcombine.high %v89_v22, %v93_v23 }
  0x7e   :  { %905 = vmatpush1.bf16.msra.mxu1 %v2304_v27  ;;  %v2612_v27 = vld [vmem:[#allocation6 + $0x84] ss:$8 sps:$4 sm:$0xff]  }
  0x7f   :  { %906 = vmatprep.subr.bf16.mxu1 %v2313_v30  ;;  %v2614_v30 = vld [vmem:[#allocation6 + $0x80] ss:$8 sps:$4 sm:$0xff]   ;;  %1908 = vmatprep.subr.bf16.mxu0 %v2612_v27  ;;  %v189_v27 = vld [vmem:[#allocation4 + $0x330] sm:$0xff] }
  0x80   :  { %1909 = vmatpush1.bf16.msra.mxu0 %v2614_v30  ;;  %v193_v30 = vld [vmem:[#allocation4 + $0x350] sm:$0xff] }
  0x81   :  { %1910 = vmatprep.subr.bf16.mxu0 %v2615_v33 }
  0x82   :  { %907 = vmatpush1.bf16.msra.mxu1 %v2312_v31  ;;  %v2274_v31 = vcombine.low %v89_v22, %v93_v23  ;;  %v177_v22 = vld [vmem:[#allocation4 + $0x2d0] sm:$0xff] }
  0x83   :  { %908 = vmatprep.subr.bf16.mxu1 %v2321_v34  ;;  %v105_v34 = vld [vmem:[#allocation4 + $0x90] sm:$0xff] }
  0x84   :  { %1911 = vmatpush1.bf16.msra.mxu0 %v2617_v36  ;;  %v181_v23 = vld [vmem:[#allocation4 + $0x2f0] sm:$0xff] }
  0x85   :  { %v2362_v28 = vcombine.low %v177_v22, %v181_v23 }
  0x86   :  { %909 = vmatpush1.bf16.msra.mxu1 %v2320_v35  ;;  %v109_v35 = vld [vmem:[#allocation4 + $0xb0] sm:$0xff] }
  0x87   :  { %910 = vmatprep.subr.bf16.mxu1 %v2329_v37  ;;  %v2618_v37 = vld [vmem:[#allocation6 + $0xa4] ss:$8 sps:$4 sm:$0xff]   ;;  %v2290_v44 = vcombine.low %v105_v34, %v109_v35 }
  0x88   :  { %1912 = vmatprep.subr.bf16.mxu0 %v2618_v37 }
  0x8a   :  { %911 = vmatpush1.bf16.msra.mxu1 %v2328_v39  ;;  %v2291_v39 = vcombine.high %v105_v34, %v109_v35  ;;  %v201_v34 = vld [vmem:[#allocation4 + $0x390] sm:$0xff] }
  0x8b   :  { %912 = vmatprep.subr.bf16.mxu1 %v2337_v40  ;;  %v2620_v40 = vld [vmem:[#allocation6 + $0xa0] ss:$8 sps:$4 sm:$0xff]   ;;  %v205_v35 = vld [vmem:[#allocation4 + $0x3b0] sm:$0xff] }
  0x8c   :  { %1913 = vmatpush1.bf16.msra.mxu0 %v2620_v40  ;;  %v2387_v37 = vcombine.high %v201_v34, %v205_v35  ;;  %v2386_v40 = vcombine.low %v201_v34, %v205_v35  ;;  %v202_v35 = vld [vmem:[#allocation4 + $0x398] sm:$0xff] }
  0x8d   :  { %1914 = vmatprep.subr.bf16.mxu0 %v2621_v43  ;;  %v94_v43 = vld [vmem:[#allocation4 + $0x38] sm:$0xff] }
  0x8e   :  { %913 = vmatpush1.bf16.msra.mxu1 %v2336_v45  ;;  %v2299_v45 = vcombine.high %v113_v41, %v117_v42  ;;  %v90_v42 = vld [vmem:[#allocation4 + $0x18] sm:$0xff] }
  0x8f   :  { %914 = vmatprep.subr.bf16.mxu1 %v2345_v46  ;;  %v2623_v46 = vld [vmem:[#allocation6 + $0xb0] ss:$8 sps:$4 sm:$0xff]  }
  0x90   :  { %1915 = vmatpush1.bf16.msra.mxu0 %v2623_v46  ;;  %v98_v46 = vld [vmem:[#allocation4 + $0x58] sm:$0xff] }
  0x91   :  { %1916 = vmatprep.subr.bf16.mxu0 %v2624_v49 }
  0x92   :  { %915 = vmatpush1.bf16.msra.mxu1 %v2344_v51  ;;  %v2307_v51 = vcombine.high %v121_v47, %v125_v48  ;;  %v102_v47 = vld [vmem:[#allocation4 + $0x78] sm:$0xff]  ;;  %v2276_v48 = vcombine.low %v90_v42, %v94_v43 }
  0x93   :  { %916 = vmatprep.subr.bf16.mxu1 %v2353_v52  ;;  %v2626_v52 = vld [vmem:[#allocation6 + $0xc0] ss:$8 sps:$4 sm:$0xff]   ;;  %v2285_v49 = vcombine.high %v98_v46, %v102_v47 }
  0x94   :  { %1917 = vmatpush1.bf16.msra.mxu0 %v2626_v52  ;;  %v2284_v52 = vcombine.low %v98_v46, %v102_v47  ;;  %v2955_v47 = vld [vmem:[%s3042_s2] sm:$0xff] }
  0x95   :  { %1918 = vmatprep.subr.bf16.mxu0 %v2627_v55  ;;  %v118_v55 = vld [vmem:[#allocation4 + $0xf8] sm:$0xff] }
  0x96   :  { %917 = vmatpush1.bf16.msra.mxu1 %v2352_v57  ;;  %v2315_v57 = vcombine.high %v129_v53, %v133_v54  ;;  %v114_v54 = vld [vmem:[#allocation4 + $0xd8] sm:$0xff] }
  0x97   :  { %918 = vmatprep.subr.bf16.mxu1 %v2361_v58  ;;  %v2629_v58 = vld [vmem:[#allocation6 + $0xd0] ss:$8 sps:$4 sm:$0xff]   ;;  %v2300_v60 = vcombine.low %v114_v54, %v118_v55 }
  0x98   :  { %1919 = vmatpush1.bf16.msra.mxu0 %v2629_v58  ;;  %v122_v58 = vld [vmem:[#allocation4 + $0x118] sm:$0xff] }
  0x9a   :  { %919 = vmatpush1.bf16.msra.mxu1 %v2360_v63  ;;  %v2630_v63 = vld [vmem:[#allocation6 + $0xe4] ss:$8 sps:$4 sm:$0xff]  }
  0x9b   :  { %920 = vmatprep.subr.bf16.mxu1 %v2369_v0  ;;  %v145_v0 = vld [vmem:[#allocation4 + $0x1d0] sm:$0xff]  ;;  %1920 = vmatprep.subr.bf16.mxu0 %v2630_v63  ;;  %v134_v63 = vld [vmem:[#allocation4 + $0x178] sm:$0xff] }
  0x9c   :  { %v2331_v4 = vcombine.high %v145_v0, %v149_v1  ;;  %1921 = vmatpush1.bf16.msra.mxu0 %v2632_v2  ;;  %v2330_v10 = vcombine.low %v145_v0, %v149_v1  ;;  %v2308_v0 = vcombine.low %v122_v58, %v126_v59  ;;  %v138_v1 = vld [vmem:[#allocation4 + $0x198] sm:$0xff] }
  0x9d   :  { %v142_v2 = vld [vmem:[#allocation4 + $0x1b8] sm:$0xff] }
  0x9e   :  { %921 = vmatpush1.bf16.msra.mxu1 %v2368_v5  ;;  %v2633_v5 = vld [vmem:[#allocation6 + $0xf4] ss:$8 sps:$4 sm:$0xff]  }
  0x9f   :  { %922 = vmatprep.subr.bf16.mxu1 %v2377_v6  ;;  %v153_v6 = vld [vmem:[#allocation4 + $0x210] sm:$0xff]  ;;  %1922 = vmatprep.subr.bf16.mxu0 %v2633_v5  ;;  %v146_v5 = vld [vmem:[#allocation4 + $0x1d8] sm:$0xff] }
  0xa0   :  { %v2339_v11 = vcombine.high %v153_v6, %v157_v7  ;;  %1923 = vmatpush1.bf16.msra.mxu0 %v2635_v8  ;;  %v2338_v15 = vcombine.low %v153_v6, %v157_v7  ;;  %v150_v6 = vld [vmem:[#allocation4 + $0x1f8] sm:$0xff]  ;;  %v2324_v7 = vcombine.low %v138_v1, %v142_v2 }
  0xa1   :  { %v2333_v8 = vcombine.high %v146_v5, %v150_v6 }
  0xa2   :  { %923 = vmatpush1.bf16.msra.mxu1 %v2376_v12  ;;  %v2638_v12 = vld [vmem:[#allocation6 + $0x104] ss:$8 sps:$4 sm:$0xff]  }
  0xa3   :  { %924 = vmatprep.subr.bf16.mxu1 %v2385_v13  ;;  %v161_v13 = vld [vmem:[#allocation4 + $0x250] sm:$0xff]  ;;  %1933 = vmatprep.subr.bf16.mxu0 %v2638_v12  ;;  %v2332_v12 = vcombine.low %v146_v5, %v150_v6  ;;  %v2656_v6 = vld [vmem:[#allocation6 + $0x164] ss:$8 sps:$4 sm:$0xff]  }
  0xa4   :  { %v2347_v16 = vcombine.high %v161_v13, %v165_v14  ;;  %v2651_v5 = vld [vmem:[#allocation6 + $0x150] ss:$8 sps:$4 sm:$0xff]  }
  0xa6   :  { %925 = vmatpush1.bf16.msra.mxu1 %v2384_v18  ;;  %v173_v18 = vld [vmem:[#allocation4 + $0x2b0] sm:$0xff] }
  0xa7   :  { %926 = vmatprep.subr.bf16.mxu1 %v2393_v20  ;;  %v2346_v20 = vcombine.low %v161_v13, %v165_v14  ;;  %v2355_v21 = vcombine.high %v169_v17, %v173_v18  ;;  %v2354_v24 = vcombine.low %v169_v17, %v173_v18  ;;  %v162_v14 = vld [vmem:[#allocation4 + $0x258] sm:$0xff] }
  0xa8   :  { %v170_v18 = vld [vmem:[#allocation4 + $0x298] sm:$0xff] }
  0xaa   :  { %927 = vmatpush1.bf16.msra.mxu1 %v2392_v25  ;;  %v2363_v25 = vcombine.high %v177_v22, %v181_v23  ;;  %v178_v23 = vld [vmem:[#allocation4 + $0x2d8] sm:$0xff] }
  0xab   :  { %937 = vmatprep.subr.bf16.mxu1 %v2275_v26  ;;  %v185_v26 = vld [vmem:[#allocation4 + $0x310] sm:$0xff] }
  0xac   :  { %v2371_v29 = vcombine.high %v185_v26, %v189_v27 }
  0xad   :  { %929 = vmatmul.mubr.bf16.vlgmr.msra.gmra.mrb[4].mxu1 %v2940_v9 }
  0xae   :  { %938 = vmatpush1.bf16.msra.mxu1 %v2274_v31  ;;  %969 = vmatprep.mubr.bf16.mxu1 %v2934_v19  ;;  %v197_v31 = vld [vmem:[#allocation4 + $0x370] sm:$0xff] }
  0xaf   :  { %939 = vmatprep.subr.bf16.mxu1 %v2283_v32  ;;  %v2370_v32 = vcombine.low %v185_v26, %v189_v27  ;;  %v2379_v33 = vcombine.high %v193_v30, %v197_v31  ;;  %v2378_v36 = vcombine.low %v193_v30, %v197_v31  ;;  %v186_v27 = vld [vmem:[#allocation4 + $0x318] sm:$0xff] }
  0xb0   :  { %v194_v31 = vld [vmem:[#allocation4 + $0x358] sm:$0xff] }
  0xb2   :  { %940 = vmatpush1.bf16.msra.mxu1 %v2282_v38  ;;  %v209_v38 = vld [vmem:[#allocation4 + $0x3d0] sm:$0xff] }
  0xb3   :  { %941 = vmatprep.subr.bf16.mxu1 %v2291_v39  ;;  %v213_v39 = vld [vmem:[#allocation4 + $0x3f0] sm:$0xff] }
  0xb4   :  { %v2395_v41 = vcombine.high %v209_v38, %v213_v39 }
  0xb6   :  { %942 = vmatpush1.bf16.msra.mxu1 %v2290_v44  ;;  %v2394_v44 = vcombine.low %v209_v38, %v213_v39  ;;  %v210_v39 = vld [vmem:[#allocation4 + $0x3d8] sm:$0xff] }
  0xb7   :  { %943 = vmatprep.subr.bf16.mxu1 %v2299_v45  ;;  %v2277_v45 = vcombine.high %v90_v42, %v94_v43 }
  0xba   :  { %944 = vmatpush1.bf16.msra.mxu1 %v2298_v50  ;;  %v106_v50 = vld [vmem:[#allocation4 + $0x98] sm:$0xff] }
  0xbb   :  { %945 = vmatprep.subr.bf16.mxu1 %v2307_v51  ;;  %v110_v51 = vld [vmem:[#allocation4 + $0xb8] sm:$0xff] }
  0xbc   :  { %v2293_v53 = vcombine.high %v106_v50, %v110_v51 }
  0xbe   :  { %946 = vmatpush1.bf16.msra.mxu1 %v2306_v56  ;;  %v2292_v56 = vcombine.low %v106_v50, %v110_v51 }
  0xbf   :  { %947 = vmatprep.subr.bf16.mxu1 %v2315_v57  ;;  %v2301_v57 = vcombine.high %v114_v54, %v118_v55 }
  0xc2   :  { %948 = vmatpush1.bf16.msra.mxu1 %v2314_v61  ;;  %v2309_v61 = vcombine.high %v122_v58, %v126_v59 }
  0xc3   :  { %949 = vmatprep.subr.bf16.mxu1 %v2323_v62  ;;  %v130_v62 = vld [vmem:[#allocation4 + $0x158] sm:$0xff] }
  0xc6   :  { %950 = vmatpush1.bf16.msra.mxu1 %v2322_v3  ;;  %v2316_v3 = vcombine.low %v130_v62, %v134_v63 }
  0xc7   :  { %951 = vmatprep.subr.bf16.mxu1 %v2331_v4  ;;  %v2325_v4 = vcombine.high %v138_v1, %v142_v2  ;;  %v2645_v1 = vld [vmem:[#allocation6 + $0x130] ss:$8 sps:$4 sm:$0xff]   ;;  %v2650_v2 = vld [vmem:[#allocation6 + $0x144] ss:$8 sps:$4 sm:$0xff]  }
  0xca   :  { %952 = vmatpush1.bf16.msra.mxu1 %v2330_v10  ;;  %v154_v10 = vld [vmem:[#allocation4 + $0x218] sm:$0xff] }
  0xcb   :  { %953 = vmatprep.subr.bf16.mxu1 %v2339_v11  ;;  %v158_v11 = vld [vmem:[#allocation4 + $0x238] sm:$0xff] }
  0xcc   :  { %v2341_v13 = vcombine.high %v154_v10, %v158_v11 }
  0xce   :  { %954 = vmatpush1.bf16.msra.mxu1 %v2338_v15  ;;  %v166_v15 = vld [vmem:[#allocation4 + $0x278] sm:$0xff] }
  0xcf   :  { %955 = vmatprep.subr.bf16.mxu1 %v2347_v16  ;;  %v2340_v16 = vcombine.low %v154_v10, %v158_v11  ;;  %v2349_v17 = vcombine.high %v162_v14, %v166_v15  ;;  %v2657_v10 = vld [vmem:[#allocation6 + $0x170] ss:$8 sps:$4 sm:$0xff]   ;;  %v2662_v11 = vld [vmem:[#allocation6 + $0x184] ss:$8 sps:$4 sm:$0xff]  }
  0xd2   :  { %956 = vmatpush1.bf16.msra.mxu1 %v2346_v20  ;;  %v174_v20 = vld [vmem:[#allocation4 + $0x2b8] sm:$0xff] }
  0xd3   :  { %957 = vmatprep.subr.bf16.mxu1 %v2355_v21  ;;  %v2348_v21 = vcombine.low %v162_v14, %v166_v15  ;;  %v2357_v22 = vcombine.high %v170_v18, %v174_v20  ;;  %v2663_v14 = vld [vmem:[#allocation6 + $0x190] ss:$8 sps:$4 sm:$0xff]   ;;  %v2668_v15 = vld [vmem:[#allocation6 + $0x1a4] ss:$8 sps:$4 sm:$0xff]  }
  0xd6   :  { %958 = vmatpush1.bf16.msra.mxu1 %v2354_v24  ;;  %v182_v24 = vld [vmem:[#allocation4 + $0x2f8] sm:$0xff] }
  0xd7   :  { %959 = vmatprep.subr.bf16.mxu1 %v2363_v25  ;;  %v2356_v25 = vcombine.low %v170_v18, %v174_v20  ;;  %v2365_v26 = vcombine.high %v178_v23, %v182_v24  ;;  %v2669_v18 = vld [vmem:[#allocation6 + $0x1b0] ss:$8 sps:$4 sm:$0xff]   ;;  %v2674_v20 = vld [vmem:[#allocation6 + $0x1c4] ss:$8 sps:$4 sm:$0xff]  }
  0xda   :  { %960 = vmatpush1.bf16.msra.mxu1 %v2362_v28  ;;  %v190_v28 = vld [vmem:[#allocation4 + $0x338] sm:$0xff] }
  0xdb   :  { %961 = vmatprep.subr.bf16.mxu1 %v2371_v29  ;;  %v2364_v29 = vcombine.low %v178_v23, %v182_v24  ;;  %v2373_v30 = vcombine.high %v186_v27, %v190_v28  ;;  %v2675_v24 = vld [vmem:[#allocation6 + $0x1d0] ss:$8 sps:$4 sm:$0xff]  }
  0xde   :  { %962 = vmatpush1.bf16.msra.mxu1 %v2370_v32  ;;  %v198_v32 = vld [vmem:[#allocation4 + $0x378] sm:$0xff] }
  0xdf   :  { %963 = vmatprep.subr.bf16.mxu1 %v2379_v33  ;;  %v2372_v33 = vcombine.low %v186_v27, %v190_v28  ;;  %v2381_v34 = vcombine.high %v194_v31, %v198_v32 }
  0xe2   :  { %964 = vmatpush1.bf16.msra.mxu1 %v2378_v36  ;;  %v206_v36 = vld [vmem:[#allocation4 + $0x3b8] sm:$0xff] }
  0xe3   :  { %965 = vmatprep.subr.bf16.mxu1 %v2387_v37  ;;  %v2380_v37 = vcombine.low %v194_v31, %v198_v32  ;;  %v2389_v38 = vcombine.high %v202_v35, %v206_v36 }
  0xe6   :  { %966 = vmatpush1.bf16.msra.mxu1 %v2386_v40  ;;  %v214_v40 = vld [vmem:[#allocation4 + $0x3f8] sm:$0xff] }
  0xe7   :  { %967 = vmatprep.subr.bf16.mxu1 %v2395_v41  ;;  %v2388_v41 = vcombine.low %v202_v35, %v206_v36  ;;  %v2397_v42 = vcombine.high %v210_v39, %v214_v40  ;;  %v2396_v43 = vcombine.low %v210_v39, %v214_v40  ;;  %v2681_v36 = vld [vmem:[#allocation6 + $0x1f0] ss:$8 sps:$4 sm:$0xff]   ;;  %v2686_v39 = vld [vmem:[#allocation6 + $0x204] ss:$8 sps:$4 sm:$0xff]  }
  0xea   :  { %968 = vmatpush1.bf16.msra.mxu1 %v2394_v44  ;;  %v1048_v44 = vlaneseq }
  0xeb   :  { %978 = vmatprep.subr.bf16.mxu1 %v2277_v45 }
  0xec   :  { %v2949_v45 = vshrl.u32 %v1048_v44, 7  ;;  %v2689_v44 = vld [vmem:[#allocation6 + $0x214] ss:$8 sps:$4 sm:$0xff]  }
  0xed   :  { %970 = vmatmul.mubr.bf16.vlgmr.msra.gmra.mrb[8].mxu1 %v2940_v9 }
  0xee   :  { %979 = vmatpush1.bf16.msra.mxu1 %v2276_v48  ;;  %1010 = vmatprep.mubr.bf16.mxu1 %v2934_v19  ;;  %v2317_v19 = vcombine.high %v130_v62, %v134_v63  ;;  %v1050_v46 = vsub.s32 0, %v2949_v45  ;;  %v1054_v48 = vsub.s32 1, %v2949_v45  ;;  %v2639_v62 = vld [vmem:[#allocation6 + $0x110] ss:$8 sps:$4 sm:$0xff]   ;;  %v2644_v63 = vld [vmem:[#allocation6 + $0x124] ss:$8 sps:$4 sm:$0xff]  }
  0xef   :  { %980 = vmatprep.subr.bf16.mxu1 %v2285_v49  ;;  %v1058_v23 = vsub.s32 2, %v2949_v45 }
  0xf0   :  { %v1051_v49 = vrot.slane %v2955_v47, %v1050_v46 }
  0xf1   :  { %v1059_v27 = vrot.slane %v2955_v47, %v1058_v23  ;;  %v1070_v23 = vsub.s32 5, %v2949_v45 }
  0xf2   :  { %981 = vmatpush1.bf16.msra.mxu1 %v2284_v52 }
  0xf3   :  { %982 = vmatprep.subr.bf16.mxu1 %v2293_v53 }
  0xf6   :  { %983 = vmatpush1.bf16.msra.mxu1 %v2292_v56 }
  0xf7   :  { %984 = vmatprep.subr.bf16.mxu1 %v2301_v57 }
  0xfa   :  { %985 = vmatpush1.bf16.msra.mxu1 %v2300_v60  ;;  %v2636_v60 = vld [vmem:[#allocation6 + $0x100] ss:$8 sps:$4 sm:$0xff]  }
  0xfb   :  { %986 = vmatprep.subr.bf16.mxu1 %v2309_v61  ;;  %v2641_v61 = vld [vmem:[#allocation6 + $0x114] ss:$8 sps:$4 sm:$0xff]  }
  0xfe   :  { %987 = vmatpush1.bf16.msra.mxu1 %v2308_v0  ;;  %v2642_v0 = vld [vmem:[#allocation6 + $0x120] ss:$8 sps:$4 sm:$0xff]  }
  0xff   :  { %988 = vmatprep.subr.bf16.mxu1 %v2317_v19  ;;  %v2647_v19 = vld [vmem:[#allocation6 + $0x134] ss:$8 sps:$4 sm:$0xff]  }
 0x102   :  { %989 = vmatpush1.bf16.msra.mxu1 %v2316_v3  ;;  %v2648_v3 = vld [vmem:[#allocation6 + $0x140] ss:$8 sps:$4 sm:$0xff]  }
 0x103   :  { %990 = vmatprep.subr.bf16.mxu1 %v2325_v4  ;;  %v2653_v4 = vld [vmem:[#allocation6 + $0x154] ss:$8 sps:$4 sm:$0xff]  }
 0x106   :  { %991 = vmatpush1.bf16.msra.mxu1 %v2324_v7  ;;  %v2654_v7 = vld [vmem:[#allocation6 + $0x160] ss:$8 sps:$4 sm:$0xff]  }
 0x107   :  { %992 = vmatprep.subr.bf16.mxu1 %v2333_v8  ;;  %v2659_v8 = vld [vmem:[#allocation6 + $0x174] ss:$8 sps:$4 sm:$0xff]  }
 0x10a   :  { %993 = vmatpush1.bf16.msra.mxu1 %v2332_v12  ;;  %v2660_v12 = vld [vmem:[#allocation6 + $0x180] ss:$8 sps:$4 sm:$0xff]  }
 0x10b   :  { %994 = vmatprep.subr.bf16.mxu1 %v2341_v13  ;;  %v2665_v13 = vld [vmem:[#allocation6 + $0x194] ss:$8 sps:$4 sm:$0xff]  }
 0x10e   :  { %995 = vmatpush1.bf16.msra.mxu1 %v2340_v16  ;;  %v2666_v16 = vld [vmem:[#allocation6 + $0x1a0] ss:$8 sps:$4 sm:$0xff]  }
 0x10f   :  { %996 = vmatprep.subr.bf16.mxu1 %v2349_v17  ;;  %v2671_v17 = vld [vmem:[#allocation6 + $0x1b4] ss:$8 sps:$4 sm:$0xff]  }
 0x112   :  { %997 = vmatpush1.bf16.msra.mxu1 %v2348_v21  ;;  %v2672_v21 = vld [vmem:[#allocation6 + $0x1c0] ss:$8 sps:$4 sm:$0xff]  }
 0x113   :  { %998 = vmatprep.subr.bf16.mxu1 %v2357_v22  ;;  %v2677_v22 = vld [vmem:[#allocation6 + $0x1d4] ss:$8 sps:$4 sm:$0xff]  }
 0x116   :  { %999 = vmatpush1.bf16.msra.mxu1 %v2356_v25  ;;  %v1062_v25 = vsub.s32 3, %v2949_v45 }
 0x117   :  { %1000 = vmatprep.subr.bf16.mxu1 %v2365_v26  ;;  %v2680_v26 = vld [vmem:[#allocation6 + $0x1e4] ss:$8 sps:$4 sm:$0xff]  }
 0x118   :  { %v1063_v28 = vrot.slane %v2955_v47, %v1062_v25 }
 0x11a   :  { %1001 = vmatpush1.bf16.msra.mxu1 %v2364_v29  ;;  %v2678_v29 = vld [vmem:[#allocation6 + $0x1e0] ss:$8 sps:$4 sm:$0xff]  }
 0x11b   :  { %1002 = vmatprep.subr.bf16.mxu1 %v2373_v30  ;;  %v2683_v30 = vld [vmem:[#allocation6 + $0x1f4] ss:$8 sps:$4 sm:$0xff]  }
 0x11e   :  { %1003 = vmatpush1.bf16.msra.mxu1 %v2372_v33 }
 0x11f   :  { %1004 = vmatprep.subr.bf16.mxu1 %v2381_v34 }
 0x122   :  { %1005 = vmatpush1.bf16.msra.mxu1 %v2380_v37 }
 0x123   :  { %1006 = vmatprep.subr.bf16.mxu1 %v2389_v38 }
 0x126   :  { %1007 = vmatpush1.bf16.msra.mxu1 %v2388_v41 }
 0x127   :  { %1008 = vmatprep.subr.bf16.mxu1 %v2397_v42 }
 0x12a   :  { %1009 = vmatpush1.bf16.msra.mxu1 %v2396_v43  ;;  %v2684_v43 = vld [vmem:[#allocation6 + $0x200] ss:$8 sps:$4 sm:$0xff]  }
 0x12d   :  { %1011 = vmatmul.mubr.bf16.vlgmr.msra.gmra.mrb[12].mxu1 %v2940_v9  ;;  %v1055_v9 = vrot.slane %v2955_v47, %v1054_v48 }
 0x140   :  { %v889_v50 = vpop.f32.mrb[0].mxu1 }
 0x141   :  { %v1088_v51 = vadd.f32 %v1051_v49, %v889_v50  ;;  %v891_v52 = vpop.f32.mrb[1].mxu1  ;;  %v2780_v49 = vld [vmem:[%s3045_s5 + $0x40] sm:$0xff]   ;;  %v2782_v50 = vld [vmem:[%s3045_s5 + $0x48] sm:$0xff]  }
 0x142   :  { %v1089_v53 = vadd.f32 %v1055_v9, %v891_v52  ;;  %v893_v54 = vpop.f32.mrb[2].mxu1  ;;  %v2781_v9 = vld [vmem:[%s3045_s5] sm:$0xff]   ;;  %2546 = vmatprep.subr.bf16.mxu1 %v2780_v49 }
 0x143   :  { %v1096_v55 = vmax.f32 %v1088_v51, 0.0  ;;  %v894_v56 = vpop.f32.mrb[3].mxu1  ;;  %v2687_v51 = vld [vmem:[#allocation6 + $0x210] ss:$8 sps:$4 sm:$0xff]   ;;  %v2692_v52 = vld [vmem:[#allocation6 + $0x224] ss:$8 sps:$4 sm:$0xff]   ;;  %2547 = vmatpush3.bf16.msra.mxu1 %v2781_v9 }
 0x144   :  { %v1097_v57 = vmax.f32 %v1089_v53, 0.0  ;;  %v2783_v53 = vld [vmem:[%s3045_s5 + $0x8] sm:$0xff]   ;;  %2548 = vmatprep.subr.bf16.mxu1 %v2782_v50  ;;  %v2784_v54 = vld [vmem:[%s3045_s5 + $0x50] sm:$0xff]  }
 0x145   :  { %v1104_v58 = vpack.c.bf16 %v1096_v55, %v1096_v55  ;;  %v2690_v55 = vld [vmem:[#allocation6 + $0x220] ss:$8 sps:$4 sm:$0xff]   ;;  %v2695_v56 = vld [vmem:[#allocation6 + $0x234] ss:$8 sps:$4 sm:$0xff]   ;;  %v2741_v50 = vld [vmem:[#allocation6 + $0x330] ss:$8 sps:$4 sm:$0xff]  }
 0x146   :  { %v1105_v59 = vpack.c.bf16 %v1097_v57, %v1097_v57  ;;  %v2785_v57 = vld [vmem:[%s3045_s5 + $0x10] sm:$0xff]   ;;  %v2738_v49 = vld [vmem:[#allocation6 + $0x320] ss:$8 sps:$4 sm:$0xff]  }
 0x147   :  { %2549 = vmatpush3.bf16.msra.mxu1 %v2783_v53  ;;  %v2743_v9 = vld [vmem:[#allocation6 + $0x334] ss:$8 sps:$4 sm:$0xff]  }
 0x148   :  { %1924 = vmatprep.mubr.bf16.mxu0 %v1105_v59  ;;  %2550 = vmatprep.subr.bf16.mxu1 %v2784_v54  ;;  %v2693_v59 = vld [vmem:[#allocation6 + $0x230] ss:$8 sps:$4 sm:$0xff]   ;;  %v2749_v53 = vld [vmem:[#allocation6 + $0x354] ss:$8 sps:$4 sm:$0xff]  }
 0x149   :  { %1925 = vmatmul.mubr.bf16.vlgmr.msra.gmra.mrb[0].mxu0 %v1104_v58  ;;  %v2786_v58 = vld [vmem:[%s3045_s5 + $0x58] sm:$0xff]  }
 0x14a   :  { %1934 = vmatpush1.bf16.msra.mxu0 %v2636_v60  ;;  %v2698_v60 = vld [vmem:[#allocation6 + $0x244] ss:$8 sps:$4 sm:$0xff]   ;;  %v2747_v54 = vld [vmem:[#allocation6 + $0x350] ss:$8 sps:$4 sm:$0xff]  }
 0x14b   :  { %1935 = vmatprep.subr.bf16.mxu0 %v2641_v61  ;;  %2551 = vmatpush3.bf16.msra.mxu1 %v2785_v57  ;;  %v2787_v61 = vld [vmem:[%s3045_s5 + $0x18] sm:$0xff]  }
 0x14c   :  { %2552 = vmatprep.subr.bf16.mxu1 %v2786_v58  ;;  %v2755_v57 = vld [vmem:[#allocation6 + $0x374] ss:$8 sps:$4 sm:$0xff]   ;;  %v2753_v58 = vld [vmem:[#allocation6 + $0x370] ss:$8 sps:$4 sm:$0xff]  }
 0x14e   :  { %1936 = vmatpush1.bf16.msra.mxu0 %v2639_v62  ;;  %v2788_v62 = vld [vmem:[%s3045_s5 + $0x60] sm:$0xff]  }
 0x14f   :  { %1937 = vmatprep.subr.bf16.mxu0 %v2644_v63  ;;  %v2696_v63 = vld [vmem:[#allocation6 + $0x240] ss:$8 sps:$4 sm:$0xff]   ;;  %2553 = vmatpush3.bf16.msra.mxu1 %v2787_v61  ;;  %v2761_v61 = vld [vmem:[#allocation6 + $0x394] ss:$8 sps:$4 sm:$0xff]  }
 0x150   :  { %2554 = vmatprep.subr.bf16.mxu1 %v2788_v62  ;;  %v2759_v62 = vld [vmem:[#allocation6 + $0x390] ss:$8 sps:$4 sm:$0xff]  }
 0x152   :  { %1938 = vmatpush1.bf16.msra.mxu0 %v2642_v0  ;;  %v2701_v0 = vld [vmem:[#allocation6 + $0x254] ss:$8 sps:$4 sm:$0xff]  }
 0x153   :  { %1939 = vmatprep.subr.bf16.mxu0 %v2647_v19  ;;  %v2789_v19 = vld [vmem:[%s3045_s5 + $0x20] sm:$0xff]  }
 0x154   :  { %2555 = vmatpush3.bf16.msra.mxu1 %v2789_v19  ;;  %v2767_v19 = vld [vmem:[#allocation6 + $0x3b4] ss:$8 sps:$4 sm:$0xff]  }
 0x156   :  { %1940 = vmatpush1.bf16.msra.mxu0 %v2645_v1  ;;  %v2790_v1 = vld [vmem:[%s3045_s5 + $0x68] sm:$0xff]  }
 0x157   :  { %1941 = vmatprep.subr.bf16.mxu0 %v2650_v2  ;;  %v2699_v2 = vld [vmem:[#allocation6 + $0x250] ss:$8 sps:$4 sm:$0xff]   ;;  %2556 = vmatprep.subr.bf16.mxu1 %v2790_v1 }
 0x158   :  { %v2765_v1 = vld [vmem:[#allocation6 + $0x3b0] ss:$8 sps:$4 sm:$0xff]  }
 0x15a   :  { %1942 = vmatpush1.bf16.msra.mxu0 %v2648_v3  ;;  %v2704_v3 = vld [vmem:[#allocation6 + $0x264] ss:$8 sps:$4 sm:$0xff]  }
 0x15b   :  { %1943 = vmatprep.subr.bf16.mxu0 %v2653_v4  ;;  %v2791_v4 = vld [vmem:[%s3045_s5 + $0x28] sm:$0xff]  }
 0x15c   :  { %2557 = vmatpush3.bf16.msra.mxu1 %v2791_v4  ;;  %v2773_v4 = vld [vmem:[#allocation6 + $0x3d4] ss:$8 sps:$4 sm:$0xff]  }
 0x15e   :  { %1944 = vmatpush1.bf16.msra.mxu0 %v2651_v5  ;;  %v2702_v5 = vld [vmem:[#allocation6 + $0x260] ss:$8 sps:$4 sm:$0xff]  }
 0x15f   :  { %1945 = vmatprep.subr.bf16.mxu0 %v2656_v6  ;;  %v2707_v6 = vld [vmem:[#allocation6 + $0x274] ss:$8 sps:$4 sm:$0xff]  }
 0x162   :  { %1946 = vmatpush1.bf16.msra.mxu0 %v2654_v7  ;;  %v2705_v7 = vld [vmem:[#allocation6 + $0x270] ss:$8 sps:$4 sm:$0xff]  }
 0x163   :  { %1947 = vmatprep.subr.bf16.mxu0 %v2659_v8  ;;  %v2710_v8 = vld [vmem:[#allocation6 + $0x284] ss:$8 sps:$4 sm:$0xff]  }
 0x166   :  { %1948 = vmatpush1.bf16.msra.mxu0 %v2657_v10  ;;  %v2708_v10 = vld [vmem:[#allocation6 + $0x280] ss:$8 sps:$4 sm:$0xff]  }
 0x167   :  { %1949 = vmatprep.subr.bf16.mxu0 %v2662_v11  ;;  %v2713_v11 = vld [vmem:[#allocation6 + $0x294] ss:$8 sps:$4 sm:$0xff]  }
 0x16a   :  { %1950 = vmatpush1.bf16.msra.mxu0 %v2660_v12  ;;  %v2711_v12 = vld [vmem:[#allocation6 + $0x290] ss:$8 sps:$4 sm:$0xff]  }
 0x16b   :  { %1951 = vmatprep.subr.bf16.mxu0 %v2665_v13  ;;  %v2716_v13 = vld [vmem:[#allocation6 + $0x2a4] ss:$8 sps:$4 sm:$0xff]  }
 0x16e   :  { %1952 = vmatpush1.bf16.msra.mxu0 %v2663_v14  ;;  %v2714_v14 = vld [vmem:[#allocation6 + $0x2a0] ss:$8 sps:$4 sm:$0xff]  }
 0x16f   :  { %1953 = vmatprep.subr.bf16.mxu0 %v2668_v15  ;;  %v2719_v15 = vld [vmem:[#allocation6 + $0x2b4] ss:$8 sps:$4 sm:$0xff]  }
 0x172   :  { %1954 = vmatpush1.bf16.msra.mxu0 %v2666_v16  ;;  %v2717_v16 = vld [vmem:[#allocation6 + $0x2b0] ss:$8 sps:$4 sm:$0xff]  }
 0x173   :  { %1955 = vmatprep.subr.bf16.mxu0 %v2671_v17  ;;  %v2722_v17 = vld [vmem:[#allocation6 + $0x2c4] ss:$8 sps:$4 sm:$0xff]  }
 0x176   :  { %1956 = vmatpush1.bf16.msra.mxu0 %v2669_v18  ;;  %v2720_v18 = vld [vmem:[#allocation6 + $0x2c0] ss:$8 sps:$4 sm:$0xff]  }
 0x177   :  { %1957 = vmatprep.subr.bf16.mxu0 %v2674_v20  ;;  %v2725_v20 = vld [vmem:[#allocation6 + $0x2d4] ss:$8 sps:$4 sm:$0xff]  }
 0x17a   :  { %1958 = vmatpush1.bf16.msra.mxu0 %v2672_v21  ;;  %v1066_v21 = vsub.s32 4, %v2949_v45 }
 0x17b   :  { %1959 = vmatprep.subr.bf16.mxu0 %v2677_v22  ;;  %v2723_v22 = vld [vmem:[#allocation6 + $0x2d0] ss:$8 sps:$4 sm:$0xff]  }
 0x17c   :  { %v1067_v25 = vrot.slane %v2955_v47, %v1066_v21 }
 0x17e   :  { %1960 = vmatpush1.bf16.msra.mxu0 %v2675_v24  ;;  %v2728_v24 = vld [vmem:[#allocation6 + $0x2e4] ss:$8 sps:$4 sm:$0xff]  }
 0x17f   :  { %1961 = vmatprep.subr.bf16.mxu0 %v2680_v26  ;;  %v1071_v26 = vrot.slane %v2955_v47, %v1070_v23 }
 0x180   :  { %v930_v31 = vpop.f32.mrb[4].mxu1 }
 0x181   :  { %v1090_v32 = vadd.f32 %v1059_v27, %v930_v31  ;;  %v932_v33 = vpop.f32.mrb[5].mxu1  ;;  %v2726_v27 = vld [vmem:[#allocation6 + $0x2e0] ss:$8 sps:$4 sm:$0xff]  }
 0x182   :  { %v1091_v34 = vadd.f32 %v1063_v28, %v932_v33  ;;  %v934_v35 = vpop.f32.mrb[6].mxu1  ;;  %1962 = vmatpush1.bf16.msra.mxu0 %v2678_v29  ;;  %v2731_v28 = vld [vmem:[#allocation6 + $0x2f4] ss:$8 sps:$4 sm:$0xff]  }
 0x183   :  { %v1098_v37 = vmax.f32 %v1090_v32, 0.0  ;;  %v935_v38 = vpop.f32.mrb[7].mxu1  ;;  %1963 = vmatprep.subr.bf16.mxu0 %v2683_v30 }
 0x184   :  { %v1099_v40 = vmax.f32 %v1091_v34, 0.0  ;;  %v2729_v34 = vld [vmem:[#allocation6 + $0x2f0] ss:$8 sps:$4 sm:$0xff]  }
 0x185   :  { %v1106_v41 = vpack.c.bf16 %v1098_v37, %v1098_v37  ;;  %v2734_v37 = vld [vmem:[#allocation6 + $0x304] ss:$8 sps:$4 sm:$0xff]  }
 0x186   :  { %v1107_v42 = vpack.c.bf16 %v1099_v40, %v1099_v40  ;;  %1964 = vmatpush1.bf16.msra.mxu0 %v2681_v36 }
 0x187   :  { %1974 = vmatprep.subr.bf16.mxu0 %v2686_v39 }
 0x188   :  { %1965 = vmatprep.mubr.bf16.mxu0 %v1107_v42  ;;  %v2737_v42 = vld [vmem:[#allocation6 + $0x314] ss:$8 sps:$4 sm:$0xff]  }
 0x189   :  { %1966 = vmatmul.mubr.bf16.vlgmr.msra.gmra.mrb[0].mxu0 %v1106_v41  ;;  %v2732_v41 = vld [vmem:[#allocation6 + $0x300] ss:$8 sps:$4 sm:$0xff]  }
 0x18a   :  { %1975 = vmatpush1.bf16.msra.mxu0 %v2684_v43  ;;  %v2735_v43 = vld [vmem:[#allocation6 + $0x310] ss:$8 sps:$4 sm:$0xff]  }
 0x18b   :  { %1976 = vmatprep.subr.bf16.mxu0 %v2689_v44  ;;  %v2740_v44 = vld [vmem:[#allocation6 + $0x324] ss:$8 sps:$4 sm:$0xff]  }
 0x18e   :  { %1977 = vmatpush1.bf16.msra.mxu0 %v2687_v51  ;;  %v2746_v51 = vld [vmem:[#allocation6 + $0x344] ss:$8 sps:$4 sm:$0xff]  }
 0x18f   :  { %1978 = vmatprep.subr.bf16.mxu0 %v2692_v52  ;;  %v2744_v52 = vld [vmem:[#allocation6 + $0x340] ss:$8 sps:$4 sm:$0xff]  }
 0x192   :  { %1979 = vmatpush1.bf16.msra.mxu0 %v2690_v55  ;;  %v2752_v55 = vld [vmem:[#allocation6 + $0x364] ss:$8 sps:$4 sm:$0xff]  }
 0x193   :  { %1980 = vmatprep.subr.bf16.mxu0 %v2695_v56  ;;  %v2750_v56 = vld [vmem:[#allocation6 + $0x360] ss:$8 sps:$4 sm:$0xff]  }
 0x196   :  { %1981 = vmatpush1.bf16.msra.mxu0 %v2693_v59  ;;  %v2758_v59 = vld [vmem:[#allocation6 + $0x384] ss:$8 sps:$4 sm:$0xff]  }
 0x197   :  { %1982 = vmatprep.subr.bf16.mxu0 %v2698_v60  ;;  %v2756_v60 = vld [vmem:[#allocation6 + $0x380] ss:$8 sps:$4 sm:$0xff]  }
 0x19a   :  { %1983 = vmatpush1.bf16.msra.mxu0 %v2696_v63  ;;  %v2764_v63 = vld [vmem:[#allocation6 + $0x3a4] ss:$8 sps:$4 sm:$0xff]  }
 0x19b   :  { %1984 = vmatprep.subr.bf16.mxu0 %v2701_v0  ;;  %v2762_v0 = vld [vmem:[#allocation6 + $0x3a0] ss:$8 sps:$4 sm:$0xff]  }
 0x19e   :  { %1985 = vmatpush1.bf16.msra.mxu0 %v2699_v2  ;;  %v2770_v2 = vld [vmem:[#allocation6 + $0x3c4] ss:$8 sps:$4 sm:$0xff]  }
 0x19f   :  { %1986 = vmatprep.subr.bf16.mxu0 %v2704_v3  ;;  %v2768_v3 = vld [vmem:[#allocation6 + $0x3c0] ss:$8 sps:$4 sm:$0xff]  }
 0x1a2   :  { %1987 = vmatpush1.bf16.msra.mxu0 %v2702_v5  ;;  %v1074_v5 = vsub.s32 6, %v2949_v45 }
 0x1a3   :  { %1988 = vmatprep.subr.bf16.mxu0 %v2707_v6  ;;  %v2771_v6 = vld [vmem:[#allocation6 + $0x3d0] ss:$8 sps:$4 sm:$0xff]  }
 0x1a6   :  { %1989 = vmatpush1.bf16.msra.mxu0 %v2705_v7  ;;  %v1078_v7 = vsub.s32 7, %v2949_v45 }
 0x1a7   :  { %1990 = vmatprep.subr.bf16.mxu0 %v2710_v8  ;;  %v2776_v8 = vld [vmem:[#allocation6 + $0x3e4] ss:$8 sps:$4 sm:$0xff]  }
 0x1aa   :  { %1991 = vmatpush1.bf16.msra.mxu0 %v2708_v10  ;;  %v1075_v10 = vrot.slane %v2955_v47, %v1074_v5 }
 0x1ab   :  { %1992 = vmatprep.subr.bf16.mxu0 %v2713_v11  ;;  %v1079_v11 = vrot.slane %v2955_v47, %v1078_v7  ;;  %v2792_v47 = vld [vmem:[%s3045_s5 + $0x70] sm:$0xff]  }
 0x1ac   :  { %2558 = vmatprep.subr.bf16.mxu1 %v2792_v47 }
 0x1ae   :  { %1993 = vmatpush1.bf16.msra.mxu0 %v2711_v12  ;;  %v2774_v12 = vld [vmem:[#allocation6 + $0x3e0] ss:$8 sps:$4 sm:$0xff]  }
 0x1af   :  { %1994 = vmatprep.subr.bf16.mxu0 %v2716_v13  ;;  %v2779_v13 = vld [vmem:[#allocation6 + $0x3f4] ss:$8 sps:$4 sm:$0xff]  }
 0x1b2   :  { %1995 = vmatpush1.bf16.msra.mxu0 %v2714_v14 }
 0x1b3   :  { %1996 = vmatprep.subr.bf16.mxu0 %v2719_v15 }
 0x1b6   :  { %1997 = vmatpush1.bf16.msra.mxu0 %v2717_v16 }
 0x1b7   :  { %1998 = vmatprep.subr.bf16.mxu0 %v2722_v17 }
 0x1ba   :  { %1999 = vmatpush1.bf16.msra.mxu0 %v2720_v18 }
 0x1bb   :  { %2000 = vmatprep.subr.bf16.mxu0 %v2725_v20  ;;  %v2777_v20 = vld [vmem:[#allocation6 + $0x3f0] ss:$8 sps:$4 sm:$0xff]  }
 0x1be   :  { %2001 = vmatpush1.bf16.msra.mxu0 %v2723_v22 }
 0x1bf   :  { %2002 = vmatprep.subr.bf16.mxu0 %v2728_v24 }
 0x1c0   :  { %v971_v29 = vpop.f32.mrb[8].mxu1 }
 0x1c1   :  { %v1092_v30 = vadd.f32 %v1067_v25, %v971_v29  ;;  %v973_v31 = vpop.f32.mrb[9].mxu1  ;;  %v1240_v29 = vld [vmem:[%s3044_s4] sm:$0x3] }
 0x1c2   :  { %v1093_v32 = vadd.f32 %v1071_v26, %v973_v31  ;;  %v975_v33 = vpop.f32.mrb[10].mxu1  ;;  %2003 = vmatpush1.bf16.msra.mxu0 %v2726_v27  ;;  %v2793_v26 = vld [vmem:[%s3045_s5 + $0x30] sm:$0xff]   ;;  %v2794_v27 = vld [vmem:[%s3045_s5 + $0x78] sm:$0xff]   ;;  %v1249_v31 = vrot.slane %v1240_v29, %v1054_v48 }
 0x1c3   :  { %v1100_v35 = vmax.f32 %v1092_v30, 0.0  ;;  %v976_v36 = vpop.f32.mrb[11].mxu1  ;;  %2004 = vmatprep.subr.bf16.mxu0 %v2731_v28  ;;  %2559 = vmatpush3.bf16.msra.mxu1 %v2793_v26  ;;  %v2795_v28 = vld [vmem:[%s3045_s5 + $0x38] sm:$0xff]   ;;  %v1245_v30 = vrot.slane %v1240_v29, %v1050_v46  ;;  %v2526_v46 = vld [vmem:[%s3046_s6] ss:$0 sm:$0xff] }
 0x1c4   :  { %v1101_v38 = vmax.f32 %v1093_v32, 0.0  ;;  %2560 = vmatprep.subr.bf16.mxu1 %v2794_v27 }
 0x1c5   :  { %v1108_v39 = vpack.c.bf16 %v1100_v35, %v1100_v35 }
 0x1c6   :  { %v1109_v40 = vpack.c.bf16 %v1101_v38, %v1101_v38  ;;  %2005 = vmatpush1.bf16.msra.mxu0 %v2729_v34 }
 0x1c7   :  { %2015 = vmatprep.subr.bf16.mxu0 %v2734_v37  ;;  %2561 = vmatpush3.bf16.msra.mxu1 %v2795_v28 }
 0x1c8   :  { %2006 = vmatprep.mubr.bf16.mxu0 %v1109_v40 }
 0x1c9   :  { %2007 = vmatmul.mubr.bf16.vlgmr.msra.gmra.mrb[0].mxu0 %v1108_v39 }
 0x1ca   :  { %2016 = vmatpush1.bf16.msra.mxu0 %v2732_v41 }
 0x1cb   :  { %2017 = vmatprep.subr.bf16.mxu0 %v2737_v42 }
 0x1ce   :  { %2018 = vmatpush1.bf16.msra.mxu0 %v2735_v43 }
 0x1cf   :  { %2019 = vmatprep.subr.bf16.mxu0 %v2740_v44 }
 0x1d2   :  { %2020 = vmatpush1.bf16.msra.mxu0 %v2738_v49 }
 0x1d3   :  { %2021 = vmatprep.subr.bf16.mxu0 %v2743_v9  ;;  %v2543_v9 = vld [vmem:[%s3047_s7] ss:$0 sm:$0xff] }
 0x1d6   :  { %2022 = vmatpush1.bf16.msra.mxu0 %v2741_v50 }
 0x1d7   :  { %2023 = vmatprep.subr.bf16.mxu0 %v2746_v51 }
 0x1da   :  { %2024 = vmatpush1.bf16.msra.mxu0 %v2744_v52 }
 0x1db   :  { %2025 = vmatprep.subr.bf16.mxu0 %v2749_v53  ;;  %v2544_v53 = vld [vmem:[#allocation3] ss:$0 sm:$0xff] }
 0x1de   :  { %2026 = vmatpush1.bf16.msra.mxu0 %v2747_v54 }
 0x1df   :  { %2027 = vmatprep.subr.bf16.mxu0 %v2752_v55 }
 0x1e2   :  { %2028 = vmatpush1.bf16.msra.mxu0 %v2750_v56 }
 0x1e3   :  { %2029 = vmatprep.subr.bf16.mxu0 %v2755_v57 }
 0x1e6   :  { %2030 = vmatpush1.bf16.msra.mxu0 %v2753_v58 }
 0x1e7   :  { %2031 = vmatprep.subr.bf16.mxu0 %v2758_v59 }
 0x1ea   :  { %2032 = vmatpush1.bf16.msra.mxu0 %v2756_v60 }
 0x1eb   :  { %2033 = vmatprep.subr.bf16.mxu0 %v2761_v61 }
 0x1ee   :  { %2034 = vmatpush1.bf16.msra.mxu0 %v2759_v62 }
 0x1ef   :  { %2035 = vmatprep.subr.bf16.mxu0 %v2764_v63 }
 0x1f2   :  { %2036 = vmatpush1.bf16.msra.mxu0 %v2762_v0 }
 0x1f3   :  { %2037 = vmatprep.subr.bf16.mxu0 %v2767_v19 }
 0x1f6   :  { %2038 = vmatpush1.bf16.msra.mxu0 %v2765_v1 }
 0x1f7   :  { %2039 = vmatprep.subr.bf16.mxu0 %v2770_v2 }
 0x1fa   :  { %2040 = vmatpush1.bf16.msra.mxu0 %v2768_v3 }
 0x1fb   :  { %2041 = vmatprep.subr.bf16.mxu0 %v2773_v4 }
 0x1fe   :  { %2042 = vmatpush1.bf16.msra.mxu0 %v2771_v6 }
 0x1ff   :  { %2043 = vmatprep.subr.bf16.mxu0 %v2776_v8 }
 0x200   :  { %v1012_v14 = vpop.f32.mrb[12].mxu1 }
 0x201   :  { %v1094_v15 = vadd.f32 %v1075_v10, %v1012_v14  ;;  %v1014_v16 = vpop.f32.mrb[13].mxu1 }
 0x202   :  { %v1095_v17 = vadd.f32 %v1079_v11, %v1014_v16  ;;  %v1016_v18 = vpop.f32.mrb[14].mxu1  ;;  %2044 = vmatpush1.bf16.msra.mxu0 %v2774_v12 }
 0x203   :  { %v1102_v21 = vmax.f32 %v1094_v15, 0.0  ;;  %v1017_v22 = vpop.f32.mrb[15].mxu1  ;;  %2045 = vmatprep.subr.bf16.mxu0 %v2779_v13 }
 0x204   :  { %v1103_v23 = vmax.f32 %v1095_v17, 0.0 }
 0x205   :  { %v1110_v25 = vpack.c.bf16 %v1102_v21, %v1102_v21 }
 0x206   :  { %v1111_v24 = vpack.c.bf16 %v1103_v23, %v1103_v23  ;;  %2046 = vmatpush1.bf16.msra.mxu0 %v2777_v20 }
 0x208   :  { %2047 = vmatprep.mubr.bf16.mxu0 %v1111_v24 }
 0x209   :  { %2048 = vmatmul.mubr.bf16.vlgmr.msra.gmra.mrb[0].mxu0 %v1110_v25 }
 0x2dc   :  { %v2049_v32 = vpop.f32.mrb[0].mxu0 }
 0x2dd   :  { %v2568_v33 = vadd.f32 %v2049_v32, %v1245_v30  ;;  %v2051_v34 = vpop.f32.mrb[1].mxu0 }
 0x2de   :  { %v2569_v35 = vadd.f32 %v2051_v34, %v1249_v31  ;;  %v2053_v36 = vpop.f32.mrb[2].mxu0 }
 0x2df   :  { %v2056_v37 = vmax.f32 %v2568_v33, 0.0  ;;  %v2054_v38 = vpop.f32.mrb[3].mxu0 }
 0x2e0   :  { %v2057_v39 = vmax.f32 %v2569_v35, 0.0 }
 0x2e1   :  { %v2058_v41 = vpack.c.bf16 %v2056_v37, %v2056_v37 }
 0x2e2   :  { %v2059_v40 = vpack.c.bf16 %v2057_v39, %v2057_v39 }
 0x2e4   :  { %2227 = vmatprep.mubr.bf16.mxu1 %v2059_v40 }
 0x2e5   :  { %2228 = vmatmul.mubr.bf16.vlgmr.msra.gmra.mrb[16].mxu1 %v2058_v41 }
 0x3b8   :  { %v2562_v42 = vpop.f32.mrb[16].mxu1 }
 0x3b9   :  { %v2563_v43 = vpop.f32.mrb[17].mxu1 }
 0x3ba   :  { %v2564_v45 = vadd.f32 %v2563_v43, %v2562_v42  ;;  %v2565_v48 = vpop.f32.mrb[18].mxu1 }
 0x3bb   :  { %v2566_v44 = vpop.f32.mrb[19].mxu1 }
 0x3bc   :  { %v2230_v49 = vadd.f32 %v2564_v45, %v2526_v46 }
 0x3be   :  { %v2235_v50 = vmax.f32 %v2230_v49, 0.0 }
 0x3c0   :  { %v2243_v51 = vmul.f32 %v2543_v9, %v2235_v50 }
 0x3c2   :  { %v2245_v52 = vsel %vm2244_vm0, %v2243_v51, 0.0 }
 0x3c3   :  { %2246 = vadd.xlane.f32.xlu0 %v2245_v52 }
 0x450   :  { %v2247_v54 = vpop.xlane.xlu0 %2246 }
 0x451   :  { %v2255_v55 = vadd.f32 %v2544_v53, %v2247_v54 }
 0x453   :  { %v2545_v56 = vmul.f32 -1.442695, %v2255_v55 }
 0x455   :  { %2796 = vpow2.f32 %v2545_v56 }
 0x45f   :  { %v2797_v57 = vpop.eup %2796 }
 0x460   :  { %v2259_v58 = vadd.f32 1.0, %v2797_v57 }
 0x462   :  { %2798 = vrcp.f32 %v2259_v58 }
 0x46c   :  { %v2799_v59 = vpop.eup %2798 }
 0x46d   :  { %2263 = vst.msk [vmem:[%s3049_s9] sm:$0xff] %vm2262_vm1, %v2799_v59 }
 0x46e   :  { %2268 = vsyncpa [#allocation5], 1 }
 0x46f   :  { %2269 = vsyncpa [#allocation7], 1 }

</bundles_post_ra>
